<compile_context>
chip_gen: v7x
topology: tpu7x:2x2x1
jax: 0.10.0
libtpu: 0.0.40
codegen_flags: <defaults>
</compile_context>

<pallas_src>
import math

import jax
import jax.numpy as jnp
from jax import lax
from jax.experimental import pallas as pl
from jax.experimental.pallas import tpu as pltpu

# ---------------- small synthetic BERT config ----------------
VOCAB = 100
HIDDEN = 128
HEADS = 2
HEAD_DIM = HIDDEN // HEADS
INTER = 256
LAYERS = 2
MAX_POS = 32
NUM_CLASSES = 2
HEAD_PAD = 128                   # classifier output padded to one full lane width
LANE = 128                       # per-head Q/K/V padded to a full 128-lane group
QKV_W = HEADS * 3 * LANE         # padded fused-QKV width (768)
CTX_W = HEADS * LANE             # padded context-slab width (256)
LN_EPS = 1e-12


# ---------------- in-kernel helpers (f32 math) ----------------
def _ln(x, g, b):
    mu = jnp.mean(x, axis=-1, keepdims=True)
    xc = x - mu
    var = jnp.mean(xc * xc, axis=-1, keepdims=True)
    return xc * lax.rsqrt(var + LN_EPS) * g + b


def _gelu(y):
    # TODO(synk): HF BERT uses exact (erf) GELU; tanh approximation used here.
    c = jnp.float32(0.7978845608028654)  # sqrt(2/pi)
    return 0.5 * y * (1.0 + jnp.tanh(c * (y + 0.044715 * y * y * y)))


# ---------------- fused whole-model kernel ----------------
def _make_fused_kernel(B, S):
    def kernel(h0_ref, mask_ref, embg_ref, embb_ref,
               wqkv_ref, bqkv_ref, wo_ref, bo_ref, ln1g_ref, ln1b_ref,
               w1_ref, b1_ref, w2_ref, b2_ref, ln2g_ref, ln2b_ref,
               poolw_ref, poolb_ref, fcw_ref, fcb_ref,
               out_ref, h_sc, ctx_sc):
        l = pl.program_id(0)

        # layer 0: embedding LayerNorm -> VMEM-resident hidden state
        @pl.when(l == 0)
        def _():
            h_sc[...] = _ln(h0_ref[...], embg_ref[...], embb_ref[...])

        x = h_sc[...]                                   # (B*S, H) f32
        xb = x.astype(jnp.bfloat16)

        # fused, head-padded Q|K|V projection: one (B*S,H)x(H,6*128) MXU matmul.
        # 1/sqrt(HEAD_DIM) already folded into the Q slices of wqkv/bqkv.
        qkv = jnp.dot(xb, wqkv_ref[...], preferred_element_type=jnp.float32)
        qkv = qkv + bqkv_ref[...]                       # (B*S, QKV_W) f32

        # per-(batch, head) attention, unrolled; all slices are 128-lane aligned
        # and sublane-tile aligned (S multiple of 8), i.e. whole-vreg selects.
        for b in range(B):
            r = b * S
            add_mask = mask_ref[b]                      # (1, S) additive mask
            for h in range(HEADS):
                g = (h * 3) * LANE
                q = qkv[r:r + S, g:g + LANE].astype(jnp.bfloat16)
                k = qkv[r:r + S, g + LANE:g + 2 * LANE].astype(jnp.bfloat16)
                v = qkv[r:r + S, g + 2 * LANE:g + 3 * LANE].astype(jnp.bfloat16)
                s = lax.dot_general(q, k, (((1,), (1,)), ((), ())),
                                    preferred_element_type=jnp.float32)  # (S,S)
                s = s + add_mask
                s = s - jnp.max(s, axis=-1, keepdims=True)
                p = jnp.exp(s)
                p = p * pl.reciprocal(jnp.sum(p, axis=-1, keepdims=True),
                                      approx=True)
                ctx = jnp.dot(p.astype(jnp.bfloat16), v,
                              preferred_element_type=jnp.float32)        # (S,128)
                ctx_sc[r:r + S, h * LANE:(h + 1) * LANE] = ctx

        # O-projection (+ residual + LayerNorm); wo padded rows are zero so the
        # padded ctx columns contribute exactly nothing.
        attn = jnp.dot(ctx_sc[...].astype(jnp.bfloat16), wo_ref[...],
                       preferred_element_type=jnp.float32) + bo_ref[...]
        h1 = _ln(x + attn, ln1g_ref[...], ln1b_ref[...])

        # FFN (+ residual + LayerNorm); dropouts are eval-mode identity.
        f = jnp.dot(h1.astype(jnp.bfloat16), w1_ref[...],
                    preferred_element_type=jnp.float32) + b1_ref[...]
        f = _gelu(f)
        f = jnp.dot(f.astype(jnp.bfloat16), w2_ref[...],
                    preferred_element_type=jnp.float32) + b2_ref[...]
        h2 = _ln(h1 + f, ln2g_ref[...], ln2b_ref[...])
        h_sc[...] = h2

        # final layer: pooler (dense + tanh on [CLS]) + dropout(identity) + head
        @pl.when(l == LAYERS - 1)
        def _():
            cls = jnp.concatenate([h2[b * S:b * S + 1, :] for b in range(B)],
                                  axis=0)                                 # (B, H)
            pooled = jnp.tanh(
                jnp.dot(cls.astype(jnp.bfloat16), poolw_ref[...],
                        preferred_element_type=jnp.float32) + poolb_ref[...])
            logits = jnp.dot(pooled.astype(jnp.bfloat16), fcw_ref[...],
                             preferred_element_type=jnp.float32) + fcb_ref[...]
            out_ref[...] = logits.astype(out_ref.dtype)

    return kernel


def fused_bert(h0, add_mask3, p):
    """h0: (B*S, H) f32 embedding sum (pre-LN); add_mask3: (B, 1, S) additive mask."""
    BS, H = h0.shape
    B = add_mask3.shape[0]
    S = BS // B

    rep2 = lambda l: (0, 0)
    rep3 = lambda l: (0, 0, 0)
    layer3 = lambda l: (l, 0, 0)

    out = pl.pallas_call(
        _make_fused_kernel(B, S),
        out_shape=jax.ShapeDtypeStruct((B, HEAD_PAD), jnp.float32),
        grid=(LAYERS,),
        in_specs=[
            pl.BlockSpec((BS, H), rep2),                # embedding sum (pre-LN)
            pl.BlockSpec((B, 1, S), rep3),              # additive attention mask
            pl.BlockSpec((1, H), rep2),                 # emb LN gamma
            pl.BlockSpec((1, H), rep2),                 # emb LN beta
            pl.BlockSpec((None, H, QKV_W), layer3),     # wqkv  (stacked, bf16)
            pl.BlockSpec((None, 1, QKV_W), layer3),     # bqkv
            pl.BlockSpec((None, CTX_W, H), layer3),     # wo    (padded, bf16)
            pl.BlockSpec((None, 1, H), layer3),         # bo
            pl.BlockSpec((None, 1, H), layer3),         # ln1 gamma
            pl.BlockSpec((None, 1, H), layer3),         # ln1 beta
            pl.BlockSpec((None, H, INTER), layer3),     # w1 (bf16)
            pl.BlockSpec((None, 1, INTER), layer3),     # b1
            pl.BlockSpec((None, INTER, H), layer3),     # w2 (bf16)
            pl.BlockSpec((None, 1, H), layer3),         # b2
            pl.BlockSpec((None, 1, H), layer3),         # ln2 gamma
            pl.BlockSpec((None, 1, H), layer3),         # ln2 beta
            pl.BlockSpec((H, H), rep2),                 # pooler W (bf16)
            pl.BlockSpec((1, H), rep2),                 # pooler b
            pl.BlockSpec((H, HEAD_PAD), rep2),          # fc W (lane-padded, bf16)
            pl.BlockSpec((1, HEAD_PAD), rep2),          # fc b (lane-padded)
        ],
        out_specs=pl.BlockSpec((B, HEAD_PAD), rep2),
        scratch_shapes=[pltpu.VMEM((BS, H), jnp.float32),       # resident hidden state
                        pltpu.VMEM((BS, CTX_W), jnp.float32)],  # padded attn context
        compiler_params=pltpu.CompilerParams(
            dimension_semantics=("arbitrary",)),
        # TODO(synk): on v7x a (B, LAYERS) grid with ("parallel","arbitrary")
        # would engage the second TensorCore; benchmark vs this M=B*S variant.
    )(h0, add_mask3,
      p["emb_ln_g"], p["emb_ln_b"],
      p["wqkv_all"], p["bqkv_all"], p["wo_all"], p["bo_all"],
      p["ln1g_all"], p["ln1b_all"], p["w1_all"], p["b1_all"],
      p["w2_all"], p["b2_all"], p["ln2g_all"], p["ln2b_all"],
      p["pool_w"], p["pool_b"], p["fc_w_pad"], p["fc_b_pad"])
    return out[:, :NUM_CLASSES]


# ---------------- parameter init (deterministic, synthetic) ----------------
def init_params(key):
    std = 0.02
    ks = iter(jax.random.split(key, 64))

    def dense(shape):
        return jax.random.normal(next(ks), shape, jnp.float32) * std

    inv_sqrt_d = 1.0 / math.sqrt(HEAD_DIM)

    p = {
        "word_emb": dense((VOCAB, HIDDEN)),
        "pos_emb": dense((MAX_POS, HIDDEN)),
        "type_emb": dense((2, HIDDEN)),
        "emb_ln_g": jnp.ones((1, HIDDEN), jnp.float32),
        "emb_ln_b": jnp.zeros((1, HIDDEN), jnp.float32),
        "pool_w": dense((HIDDEN, HIDDEN)).astype(jnp.bfloat16),
        "pool_b": jnp.zeros((1, HIDDEN), jnp.float32),
    }
    fc_w = dense((HIDDEN, NUM_CLASSES))
    p["fc_w_pad"] = (jnp.zeros((HIDDEN, HEAD_PAD), jnp.float32)
                     .at[:, :NUM_CLASSES].set(fc_w).astype(jnp.bfloat16))
    p["fc_b_pad"] = jnp.zeros((1, HEAD_PAD), jnp.float32)

    stacks = {k: [] for k in ("wqkv", "bqkv", "wo", "bo", "ln1g", "ln1b",
                              "w1", "b1", "w2", "b2", "ln2g", "ln2b")}
    for _ in range(LAYERS):
        # 1/sqrt(head_dim) folded into the Q projection (weights + bias).
        wq = dense((HIDDEN, HIDDEN)) * inv_sqrt_d
        wk = dense((HIDDEN, HIDDEN))
        wv = dense((HIDDEN, HIDDEN))
        bq = jnp.zeros((HIDDEN,), jnp.float32) * inv_sqrt_d
        bk = jnp.zeros((HIDDEN,), jnp.float32)
        bv = jnp.zeros((HIDDEN,), jnp.float32)
        wo = dense((HIDDEN, HIDDEN))

        # head-padded fused QKV layout: per head h, lane groups [Q_h | K_h | V_h],
        # each 128 wide, real data in lanes [0:64] and zeros elsewhere, so the
        # padded lanes contribute exactly nothing to scores / context / O-proj.
        wqkv = jnp.zeros((HIDDEN, QKV_W), jnp.float32)
        bqkv = jnp.zeros((1, QKV_W), jnp.float32)
        wo_pad = jnp.zeros((CTX_W, HIDDEN), jnp.float32)
        for h in range(HEADS):
            src = slice(h * HEAD_DIM, (h + 1) * HEAD_DIM)
            base = h * 3 * LANE
            wqkv = wqkv.at[:, base:base + HEAD_DIM].set(wq[:, src])
            wqkv = wqkv.at[:, base + LANE:base + LANE + HEAD_DIM].set(wk[:, src])
            wqkv = wqkv.at[:, base + 2 * LANE:base + 2 * LANE + HEAD_DIM].set(wv[:, src])
            bqkv = bqkv.at[0, base:base + HEAD_DIM].set(bq[src])
            bqkv = bqkv.at[0, base + LANE:base + LANE + HEAD_DIM].set(bk[src])
            bqkv = bqkv.at[0, base + 2 * LANE:base + 2 * LANE + HEAD_DIM].set(bv[src])
            wo_pad = wo_pad.at[h * LANE:h * LANE + HEAD_DIM, :].set(wo[src, :])

        stacks["wqkv"].append(wqkv.astype(jnp.bfloat16))
        stacks["bqkv"].append(bqkv)
        stacks["wo"].append(wo_pad.astype(jnp.bfloat16))
        stacks["bo"].append(jnp.zeros((1, HIDDEN), jnp.float32))
        stacks["ln1g"].append(jnp.ones((1, HIDDEN), jnp.float32))
        stacks["ln1b"].append(jnp.zeros((1, HIDDEN), jnp.float32))
        stacks["w1"].append(dense((HIDDEN, INTER)).astype(jnp.bfloat16))
        stacks["b1"].append(jnp.zeros((1, INTER), jnp.float32))
        stacks["w2"].append(dense((INTER, HIDDEN)).astype(jnp.bfloat16))
        stacks["b2"].append(jnp.zeros((1, HIDDEN), jnp.float32))
        stacks["ln2g"].append(jnp.ones((1, HIDDEN), jnp.float32))
        stacks["ln2b"].append(jnp.zeros((1, HIDDEN), jnp.float32))

    for k, lst in stacks.items():
        p[k + "_all"] = jnp.stack(lst)
    return p


# ---------------- forward pass ----------------
def bert_classifier_forward(params, input_ids, attention_mask):
    B, S = input_ids.shape

    # embeddings (gathers are glue, kept in plain JAX); token_type_ids == 0
    we = params["word_emb"][input_ids]                        # (B, S, H)
    pe = params["pos_emb"][jnp.arange(S)][None, :, :]         # (1, S, H)
    te = params["type_emb"][0][None, None, :]                 # (1, 1, H)
    h0 = (we + pe + te).reshape(B * S, HIDDEN)

    # BERT-style extended additive mask, shared across heads: (B, 1, S)
    add_mask = ((1.0 - attention_mask.astype(jnp.float32)) * -10000.0
                ).reshape(B, 1, S)

    return fused_bert(h0, add_mask, params)                   # (B, NUM_CLASSES)


if __name__ == "__main__":
    key = jax.random.PRNGKey(0)
    k_param, k_ids = jax.random.split(key)

    B, S = 2, 16
    params = init_params(k_param)
    input_ids = jax.random.randint(k_ids, (B, S), 0, VOCAB, dtype=jnp.int32)
    # row 0 fully attended, row 1 has last 4 positions padded out
    attention_mask = (jnp.arange(S)[None, :] < jnp.array([[S], [S - 4]])).astype(jnp.int32)

    logits = jax.jit(bert_classifier_forward)(params, input_ids, attention_mask)
    jax.block_until_ready(logits)
    assert logits.shape == (B, NUM_CLASSES)
    print("KERNEL_OK")
</pallas_src>

<mosaic_0001>
module attributes {stable_mosaic.version = 11 : i64} {
  func.func @kernel(%arg0: i32, %arg1: memref<32x128xf32, #tpu.memory_space<vmem>>, %arg2: memref<2x1x16xf32, #tpu.memory_space<vmem>>, %arg3: memref<1x128xf32, #tpu.memory_space<vmem>>, %arg4: memref<1x128xf32, #tpu.memory_space<vmem>>, %arg5: memref<1x128x768xbf16, #tpu.memory_space<vmem>>, %arg6: memref<1x1x768xf32, #tpu.memory_space<vmem>>, %arg7: memref<1x256x128xbf16, #tpu.memory_space<vmem>>, %arg8: memref<1x1x128xf32, #tpu.memory_space<vmem>>, %arg9: memref<1x1x128xf32, #tpu.memory_space<vmem>>, %arg10: memref<1x1x128xf32, #tpu.memory_space<vmem>>, %arg11: memref<1x128x256xbf16, #tpu.memory_space<vmem>>, %arg12: memref<1x1x256xf32, #tpu.memory_space<vmem>>, %arg13: memref<1x256x128xbf16, #tpu.memory_space<vmem>>, %arg14: memref<1x1x128xf32, #tpu.memory_space<vmem>>, %arg15: memref<1x1x128xf32, #tpu.memory_space<vmem>>, %arg16: memref<1x1x128xf32, #tpu.memory_space<vmem>>, %arg17: memref<128x128xbf16, #tpu.memory_space<vmem>>, %arg18: memref<1x128xf32, #tpu.memory_space<vmem>>, %arg19: memref<128x128xbf16, #tpu.memory_space<vmem>>, %arg20: memref<1x128xf32, #tpu.memory_space<vmem>>, %arg21: memref<2x128xf32, #tpu.memory_space<vmem>>, %arg22: memref<32x128xf32, #tpu.memory_space<vmem>>, %arg23: memref<32x256xf32, #tpu.memory_space<vmem>>) attributes {dimension_semantics = [#tpu.dimension_semantics<arbitrary>], iteration_bounds = array<i64: 2>, scalar_prefetch = 0 : i64, scratch_operands = 2 : i64, tpu.core_type = #tpu.core_type<tc>, window_params = [{pipeline_mode = #tpu.pipeline_mode<synchronous>, transform_indices = @transform_0, window_bounds = array<i64: 32, 128>}, {pipeline_mode = #tpu.pipeline_mode<synchronous>, transform_indices = @transform_1, window_bounds = array<i64: 2, 1, 16>}, {pipeline_mode = #tpu.pipeline_mode<synchronous>, transform_indices = @transform_2, window_bounds = array<i64: 1, 128>}, {pipeline_mode = #tpu.pipeline_mode<synchronous>, transform_indices = @transform_3, window_bounds = array<i64: 1, 128>}, {transform_indices = @transform_4, window_bounds = array<i64: 1, 128, 768>}, {transform_indices = @transform_5, window_bounds = array<i64: 1, 1, 768>}, {transform_indices = @transform_6, window_bounds = array<i64: 1, 256, 128>}, {transform_indices = @transform_7, window_bounds = array<i64: 1, 1, 128>}, {transform_indices = @transform_8, window_bounds = array<i64: 1, 1, 128>}, {transform_indices = @transform_9, window_bounds = array<i64: 1, 1, 128>}, {transform_indices = @transform_10, window_bounds = array<i64: 1, 128, 256>}, {transform_indices = @transform_11, window_bounds = array<i64: 1, 1, 256>}, {transform_indices = @transform_12, window_bounds = array<i64: 1, 256, 128>}, {transform_indices = @transform_13, window_bounds = array<i64: 1, 1, 128>}, {transform_indices = @transform_14, window_bounds = array<i64: 1, 1, 128>}, {transform_indices = @transform_15, window_bounds = array<i64: 1, 1, 128>}, {pipeline_mode = #tpu.pipeline_mode<synchronous>, transform_indices = @transform_16, window_bounds = array<i64: 128, 128>}, {pipeline_mode = #tpu.pipeline_mode<synchronous>, transform_indices = @transform_17, window_bounds = array<i64: 1, 128>}, {pipeline_mode = #tpu.pipeline_mode<synchronous>, transform_indices = @transform_18, window_bounds = array<i64: 128, 128>}, {pipeline_mode = #tpu.pipeline_mode<synchronous>, transform_indices = @transform_19, window_bounds = array<i64: 1, 128>}, {pipeline_mode = #tpu.pipeline_mode<synchronous>, transform_indices = @transform_20, window_bounds = array<i64: 2, 128>}]} {
    %c0_i32 = arith.constant 0 : i32
    %0 = arith.cmpi eq, %arg0, %c0_i32 : i32
    %1 = arith.extui %0 : i1 to i32
    %c0_i32_0 = arith.constant 0 : i32
    %2 = arith.cmpi ne, %1, %c0_i32_0 : i32
    scf.if %2 {
      %c0_87 = arith.constant 0 : index
      %c0_88 = arith.constant 0 : index
      %196 = vector.load %arg1[%c0_87, %c0_88] : memref<32x128xf32, #tpu.memory_space<vmem>>, vector<32x128xf32>
      %c0_89 = arith.constant 0 : index
      %c0_90 = arith.constant 0 : index
      %197 = vector.load %arg3[%c0_89, %c0_90] : memref<1x128xf32, #tpu.memory_space<vmem>>, vector<1x128xf32>
      %c0_91 = arith.constant 0 : index
      %c0_92 = arith.constant 0 : index
      %198 = vector.load %arg4[%c0_91, %c0_92] : memref<1x128xf32, #tpu.memory_space<vmem>>, vector<1x128xf32>
      %cst_93 = arith.constant dense<0.000000e+00> : vector<32xf32>
      %199 = vector.multi_reduction <add>, %196, %cst_93 [1] : vector<32x128xf32> to vector<32xf32>
      %200 = vector.shape_cast %199 : vector<32xf32> to vector<32x1xf32>
      %cst_94 = arith.constant 1.280000e+02 : f32
      %201 = vector.broadcast %cst_94 : f32 to vector<32x1xf32>
      %202 = arith.divf %200, %201 : vector<32x1xf32>
      %203 = vector.broadcast %202 : vector<32x1xf32> to vector<32x128xf32>
      %204 = arith.subf %196, %203 : vector<32x128xf32>
      %205 = arith.mulf %204, %204 : vector<32x128xf32>
      %cst_95 = arith.constant dense<0.000000e+00> : vector<32xf32>
      %206 = vector.multi_reduction <add>, %205, %cst_95 [1] : vector<32x128xf32> to vector<32xf32>
      %207 = vector.shape_cast %206 : vector<32xf32> to vector<32x1xf32>
      %cst_96 = arith.constant 1.280000e+02 : f32
      %208 = vector.broadcast %cst_96 : f32 to vector<32x1xf32>
      %209 = arith.divf %207, %208 : vector<32x1xf32>
      %cst_97 = arith.constant 9.99999996E-13 : f32
      %210 = vector.broadcast %cst_97 : f32 to vector<32x1xf32>
      %211 = arith.addf %209, %210 : vector<32x1xf32>
      %212 = math.rsqrt %211 : vector<32x1xf32>
      %213 = vector.broadcast %212 : vector<32x1xf32> to vector<32x128xf32>
      %214 = arith.mulf %204, %213 : vector<32x128xf32>
      %215 = vector.broadcast %197 : vector<1x128xf32> to vector<32x128xf32>
      %216 = arith.mulf %214, %215 : vector<32x128xf32>
      %217 = vector.broadcast %198 : vector<1x128xf32> to vector<32x128xf32>
      %218 = arith.addf %216, %217 : vector<32x128xf32>
      %c0_98 = arith.constant 0 : index
      %c0_99 = arith.constant 0 : index
      %219 = vector.load %arg22[%c0_98, %c0_99] : memref<32x128xf32, #tpu.memory_space<vmem>>, vector<32x128xf32>
      tpu.vector_store %arg22[%c0_98, %c0_99], %218 {strides = array<i32>} : memref<32x128xf32, #tpu.memory_space<vmem>>, vector<32x128xf32>,
    } else {
    }
    %c0 = arith.constant 0 : index
    %c0_1 = arith.constant 0 : index
    %3 = vector.load %arg22[%c0, %c0_1] : memref<32x128xf32, #tpu.memory_space<vmem>>, vector<32x128xf32>
    %4 = arith.truncf %3 : vector<32x128xf32> to vector<32x128xbf16>
    %c0_2 = arith.constant 0 : index
    %c0_3 = arith.constant 0 : index
    %c0_4 = arith.constant 0 : index
    %5 = vector.load %arg5[%c0_2, %c0_3, %c0_4] : memref<1x128x768xbf16, #tpu.memory_space<vmem>>, vector<1x128x768xbf16>
    %6 = vector.shape_cast %5 : vector<1x128x768xbf16> to vector<128x768xbf16>
    %cst = arith.constant dense<0.000000e+00> : vector<32x768xf32>
    %7 = tpu.matmul %4, %6, %cst {dimension_numbers = #tpu.dot_dimension_numbers<[1], [0], [0], [1], [0, 0, 1, 1], [], []>} : vector<32x128xbf16>, vector<128x768xbf16>, vector<32x768xf32> -> vector<32x768xf32>
    %c0_5 = arith.constant 0 : index
    %c0_6 = arith.constant 0 : index
    %c0_7 = arith.constant 0 : index
    %8 = vector.load %arg6[%c0_5, %c0_6, %c0_7] : memref<1x1x768xf32, #tpu.memory_space<vmem>>, vector<1x1x768xf32>
    %9 = vector.shape_cast %8 : vector<1x1x768xf32> to vector<1x768xf32>
    %10 = vector.broadcast %9 : vector<1x768xf32> to vector<32x768xf32>
    %11 = arith.addf %7, %10 : vector<32x768xf32>
    %c0_8 = arith.constant 0 : index
    %c0_9 = arith.constant 0 : index
    %c0_10 = arith.constant 0 : index
    %12 = vector.load %arg2[%c0_8, %c0_9, %c0_10] : memref<2x1x16xf32, #tpu.memory_space<vmem>>, vector<1x1x16xf32>
    %13 = vector.shape_cast %12 : vector<1x1x16xf32> to vector<1x16xf32>
    %14 = vector.extract_strided_slice %11 {offsets = [0, 0], sizes = [16, 128], strides = [1, 1]} : vector<32x768xf32> to vector<16x128xf32>
    %15 = arith.truncf %14 : vector<16x128xf32> to vector<16x128xbf16>
    %16 = vector.extract_strided_slice %11 {offsets = [0, 128], sizes = [16, 128], strides = [1, 1]} : vector<32x768xf32> to vector<16x128xf32>
    %17 = arith.truncf %16 : vector<16x128xf32> to vector<16x128xbf16>
    %18 = vector.extract_strided_slice %11 {offsets = [0, 256], sizes = [16, 128], strides = [1, 1]} : vector<32x768xf32> to vector<16x128xf32>
    %19 = arith.truncf %18 : vector<16x128xf32> to vector<16x128xbf16>
    %cst_11 = arith.constant dense<0.000000e+00> : vector<16x16xf32>
    %20 = tpu.matmul %15, %17, %cst_11 {dimension_numbers = #tpu.dot_dimension_numbers<[1], [1], [0], [0], [0, 0, 1, 0], [], []>} : vector<16x128xbf16>, vector<16x128xbf16>, vector<16x16xf32> -> vector<16x16xf32>
    %21 = vector.broadcast %13 : vector<1x16xf32> to vector<16x16xf32>
    %22 = arith.addf %20, %21 : vector<16x16xf32>
    %cst_12 = arith.constant dense<0xFF800000> : vector<16xf32>
    %23 = vector.multi_reduction <maximumf>, %22, %cst_12 [1] : vector<16x16xf32> to vector<16xf32>
    %24 = vector.shape_cast %23 : vector<16xf32> to vector<16x1xf32>
    %25 = vector.broadcast %24 : vector<16x1xf32> to vector<16x16xf32>
    %26 = arith.subf %22, %25 : vector<16x16xf32>
    %27 = math.exp %26 : vector<16x16xf32>
    %cst_13 = arith.constant dense<0.000000e+00> : vector<16xf32>
    %28 = vector.multi_reduction <add>, %27, %cst_13 [1] : vector<16x16xf32> to vector<16xf32>
    %29 = vector.shape_cast %28 : vector<16xf32> to vector<16x1xf32>
    %30 = tpu.reciprocal %29 {approx = true} : vector<16x1xf32> -> vector<16x1xf32>
    %31 = vector.broadcast %30 : vector<16x1xf32> to vector<16x16xf32>
    %32 = arith.mulf %27, %31 : vector<16x16xf32>
    %33 = arith.truncf %32 : vector<16x16xf32> to vector<16x16xbf16>
    %cst_14 = arith.constant dense<0.000000e+00> : vector<16x128xf32>
    %34 = tpu.matmul %33, %19, %cst_14 {dimension_numbers = #tpu.dot_dimension_numbers<[1], [0], [0], [1], [0, 0, 1, 1], [], []>} : vector<16x16xbf16>, vector<16x128xbf16>, vector<16x128xf32> -> vector<16x128xf32>
    %c0_15 = arith.constant 0 : index
    %c0_16 = arith.constant 0 : index
    %35 = vector.load %arg23[%c0_15, %c0_16] : memref<32x256xf32, #tpu.memory_space<vmem>>, vector<16x128xf32>
    tpu.vector_store %arg23[%c0_15, %c0_16], %34 {strides = array<i32>} : memref<32x256xf32, #tpu.memory_space<vmem>>, vector<16x128xf32>,
    %36 = vector.extract_strided_slice %11 {offsets = [0, 384], sizes = [16, 128], strides = [1, 1]} : vector<32x768xf32> to vector<16x128xf32>
    %37 = arith.truncf %36 : vector<16x128xf32> to vector<16x128xbf16>
    %38 = vector.extract_strided_slice %11 {offsets = [0, 512], sizes = [16, 128], strides = [1, 1]} : vector<32x768xf32> to vector<16x128xf32>
    %39 = arith.truncf %38 : vector<16x128xf32> to vector<16x128xbf16>
    %40 = vector.extract_strided_slice %11 {offsets = [0, 640], sizes = [16, 128], strides = [1, 1]} : vector<32x768xf32> to vector<16x128xf32>
    %41 = arith.truncf %40 : vector<16x128xf32> to vector<16x128xbf16>
    %cst_17 = arith.constant dense<0.000000e+00> : vector<16x16xf32>
    %42 = tpu.matmul %37, %39, %cst_17 {dimension_numbers = #tpu.dot_dimension_numbers<[1], [1], [0], [0], [0, 0, 1, 0], [], []>} : vector<16x128xbf16>, vector<16x128xbf16>, vector<16x16xf32> -> vector<16x16xf32>
    %43 = vector.broadcast %13 : vector<1x16xf32> to vector<16x16xf32>
    %44 = arith.addf %42, %43 : vector<16x16xf32>
    %cst_18 = arith.constant dense<0xFF800000> : vector<16xf32>
    %45 = vector.multi_reduction <maximumf>, %44, %cst_18 [1] : vector<16x16xf32> to vector<16xf32>
    %46 = vector.shape_cast %45 : vector<16xf32> to vector<16x1xf32>
    %47 = vector.broadcast %46 : vector<16x1xf32> to vector<16x16xf32>
    %48 = arith.subf %44, %47 : vector<16x16xf32>
    %49 = math.exp %48 : vector<16x16xf32>
    %cst_19 = arith.constant dense<0.000000e+00> : vector<16xf32>
    %50 = vector.multi_reduction <add>, %49, %cst_19 [1] : vector<16x16xf32> to vector<16xf32>
    %51 = vector.shape_cast %50 : vector<16xf32> to vector<16x1xf32>
    %52 = tpu.reciprocal %51 {approx = true} : vector<16x1xf32> -> vector<16x1xf32>
    %53 = vector.broadcast %52 : vector<16x1xf32> to vector<16x16xf32>
    %54 = arith.mulf %49, %53 : vector<16x16xf32>
    %55 = arith.truncf %54 : vector<16x16xf32> to vector<16x16xbf16>
    %cst_20 = arith.constant dense<0.000000e+00> : vector<16x128xf32>
    %56 = tpu.matmul %55, %41, %cst_20 {dimension_numbers = #tpu.dot_dimension_numbers<[1], [0], [0], [1], [0, 0, 1, 1], [], []>} : vector<16x16xbf16>, vector<16x128xbf16>, vector<16x128xf32> -> vector<16x128xf32>
    %c0_21 = arith.constant 0 : index
    %c128 = arith.constant 128 : index
    %57 = vector.load %arg23[%c0_21, %c128] : memref<32x256xf32, #tpu.memory_space<vmem>>, vector<16x128xf32>
    tpu.vector_store %arg23[%c0_21, %c128], %56 {strides = array<i32>} : memref<32x256xf32, #tpu.memory_space<vmem>>, vector<16x128xf32>,
    %c1 = arith.constant 1 : index
    %c0_22 = arith.constant 0 : index
    %c0_23 = arith.constant 0 : index
    %58 = vector.load %arg2[%c1, %c0_22, %c0_23] : memref<2x1x16xf32, #tpu.memory_space<vmem>>, vector<1x1x16xf32>
    %59 = vector.shape_cast %58 : vector<1x1x16xf32> to vector<1x16xf32>
    %60 = vector.extract_strided_slice %11 {offsets = [16, 0], sizes = [16, 128], strides = [1, 1]} : vector<32x768xf32> to vector<16x128xf32>
    %61 = arith.truncf %60 : vector<16x128xf32> to vector<16x128xbf16>
    %62 = vector.extract_strided_slice %11 {offsets = [16, 128], sizes = [16, 128], strides = [1, 1]} : vector<32x768xf32> to vector<16x128xf32>
    %63 = arith.truncf %62 : vector<16x128xf32> to vector<16x128xbf16>
    %64 = vector.extract_strided_slice %11 {offsets = [16, 256], sizes = [16, 128], strides = [1, 1]} : vector<32x768xf32> to vector<16x128xf32>
    %65 = arith.truncf %64 : vector<16x128xf32> to vector<16x128xbf16>
    %cst_24 = arith.constant dense<0.000000e+00> : vector<16x16xf32>
    %66 = tpu.matmul %61, %63, %cst_24 {dimension_numbers = #tpu.dot_dimension_numbers<[1], [1], [0], [0], [0, 0, 1, 0], [], []>} : vector<16x128xbf16>, vector<16x128xbf16>, vector<16x16xf32> -> vector<16x16xf32>
    %67 = vector.broadcast %59 : vector<1x16xf32> to vector<16x16xf32>
    %68 = arith.addf %66, %67 : vector<16x16xf32>
    %cst_25 = arith.constant dense<0xFF800000> : vector<16xf32>
    %69 = vector.multi_reduction <maximumf>, %68, %cst_25 [1] : vector<16x16xf32> to vector<16xf32>
    %70 = vector.shape_cast %69 : vector<16xf32> to vector<16x1xf32>
    %71 = vector.broadcast %70 : vector<16x1xf32> to vector<16x16xf32>
    %72 = arith.subf %68, %71 : vector<16x16xf32>
    %73 = math.exp %72 : vector<16x16xf32>
    %cst_26 = arith.constant dense<0.000000e+00> : vector<16xf32>
    %74 = vector.multi_reduction <add>, %73, %cst_26 [1] : vector<16x16xf32> to vector<16xf32>
    %75 = vector.shape_cast %74 : vector<16xf32> to vector<16x1xf32>
    %76 = tpu.reciprocal %75 {approx = true} : vector<16x1xf32> -> vector<16x1xf32>
    %77 = vector.broadcast %76 : vector<16x1xf32> to vector<16x16xf32>
    %78 = arith.mulf %73, %77 : vector<16x16xf32>
    %79 = arith.truncf %78 : vector<16x16xf32> to vector<16x16xbf16>
    %cst_27 = arith.constant dense<0.000000e+00> : vector<16x128xf32>
    %80 = tpu.matmul %79, %65, %cst_27 {dimension_numbers = #tpu.dot_dimension_numbers<[1], [0], [0], [1], [0, 0, 1, 1], [], []>} : vector<16x16xbf16>, vector<16x128xbf16>, vector<16x128xf32> -> vector<16x128xf32>
    %c16 = arith.constant 16 : index
    %c0_28 = arith.constant 0 : index
    %81 = vector.load %arg23[%c16, %c0_28] : memref<32x256xf32, #tpu.memory_space<vmem>>, vector<16x128xf32>
    tpu.vector_store %arg23[%c16, %c0_28], %80 {strides = array<i32>} : memref<32x256xf32, #tpu.memory_space<vmem>>, vector<16x128xf32>,
    %82 = vector.extract_strided_slice %11 {offsets = [16, 384], sizes = [16, 128], strides = [1, 1]} : vector<32x768xf32> to vector<16x128xf32>
    %83 = arith.truncf %82 : vector<16x128xf32> to vector<16x128xbf16>
    %84 = vector.extract_strided_slice %11 {offsets = [16, 512], sizes = [16, 128], strides = [1, 1]} : vector<32x768xf32> to vector<16x128xf32>
    %85 = arith.truncf %84 : vector<16x128xf32> to vector<16x128xbf16>
    %86 = vector.extract_strided_slice %11 {offsets = [16, 640], sizes = [16, 128], strides = [1, 1]} : vector<32x768xf32> to vector<16x128xf32>
    %87 = arith.truncf %86 : vector<16x128xf32> to vector<16x128xbf16>
    %cst_29 = arith.constant dense<0.000000e+00> : vector<16x16xf32>
    %88 = tpu.matmul %83, %85, %cst_29 {dimension_numbers = #tpu.dot_dimension_numbers<[1], [1], [0], [0], [0, 0, 1, 0], [], []>} : vector<16x128xbf16>, vector<16x128xbf16>, vector<16x16xf32> -> vector<16x16xf32>
    %89 = vector.broadcast %59 : vector<1x16xf32> to vector<16x16xf32>
    %90 = arith.addf %88, %89 : vector<16x16xf32>
    %cst_30 = arith.constant dense<0xFF800000> : vector<16xf32>
    %91 = vector.multi_reduction <maximumf>, %90, %cst_30 [1] : vector<16x16xf32> to vector<16xf32>
    %92 = vector.shape_cast %91 : vector<16xf32> to vector<16x1xf32>
    %93 = vector.broadcast %92 : vector<16x1xf32> to vector<16x16xf32>
    %94 = arith.subf %90, %93 : vector<16x16xf32>
    %95 = math.exp %94 : vector<16x16xf32>
    %cst_31 = arith.constant dense<0.000000e+00> : vector<16xf32>
    %96 = vector.multi_reduction <add>, %95, %cst_31 [1] : vector<16x16xf32> to vector<16xf32>
    %97 = vector.shape_cast %96 : vector<16xf32> to vector<16x1xf32>
    %98 = tpu.reciprocal %97 {approx = true} : vector<16x1xf32> -> vector<16x1xf32>
    %99 = vector.broadcast %98 : vector<16x1xf32> to vector<16x16xf32>
    %100 = arith.mulf %95, %99 : vector<16x16xf32>
    %101 = arith.truncf %100 : vector<16x16xf32> to vector<16x16xbf16>
    %cst_32 = arith.constant dense<0.000000e+00> : vector<16x128xf32>
    %102 = tpu.matmul %101, %87, %cst_32 {dimension_numbers = #tpu.dot_dimension_numbers<[1], [0], [0], [1], [0, 0, 1, 1], [], []>} : vector<16x16xbf16>, vector<16x128xbf16>, vector<16x128xf32> -> vector<16x128xf32>
    %c16_33 = arith.constant 16 : index
    %c128_34 = arith.constant 128 : index
    %103 = vector.load %arg23[%c16_33, %c128_34] : memref<32x256xf32, #tpu.memory_space<vmem>>, vector<16x128xf32>
    tpu.vector_store %arg23[%c16_33, %c128_34], %102 {strides = array<i32>} : memref<32x256xf32, #tpu.memory_space<vmem>>, vector<16x128xf32>,
    %c0_35 = arith.constant 0 : index
    %c0_36 = arith.constant 0 : index
    %104 = vector.load %arg23[%c0_35, %c0_36] : memref<32x256xf32, #tpu.memory_space<vmem>>, vector<32x256xf32>
    %105 = arith.truncf %104 : vector<32x256xf32> to vector<32x256xbf16>
    %c0_37 = arith.constant 0 : index
    %c0_38 = arith.constant 0 : index
    %c0_39 = arith.constant 0 : index
    %106 = vector.load %arg7[%c0_37, %c0_38, %c0_39] : memref<1x256x128xbf16, #tpu.memory_space<vmem>>, vector<1x256x128xbf16>
    %107 = vector.shape_cast %106 : vector<1x256x128xbf16> to vector<256x128xbf16>
    %cst_40 = arith.constant dense<0.000000e+00> : vector<32x128xf32>
    %108 = tpu.matmul %105, %107, %cst_40 {dimension_numbers = #tpu.dot_dimension_numbers<[1], [0], [0], [1], [0, 0, 1, 1], [], []>} : vector<32x256xbf16>, vector<256x128xbf16>, vector<32x128xf32> -> vector<32x128xf32>
    %c0_41 = arith.constant 0 : index
    %c0_42 = arith.constant 0 : index
    %c0_43 = arith.constant 0 : index
    %109 = vector.load %arg8[%c0_41, %c0_42, %c0_43] : memref<1x1x128xf32, #tpu.memory_space<vmem>>, vector<1x1x128xf32>
    %110 = vector.shape_cast %109 : vector<1x1x128xf32> to vector<1x128xf32>
    %111 = vector.broadcast %110 : vector<1x128xf32> to vector<32x128xf32>
    %112 = arith.addf %108, %111 : vector<32x128xf32>
    %113 = arith.addf %3, %112 : vector<32x128xf32>
    %c0_44 = arith.constant 0 : index
    %c0_45 = arith.constant 0 : index
    %c0_46 = arith.constant 0 : index
    %114 = vector.load %arg9[%c0_44, %c0_45, %c0_46] : memref<1x1x128xf32, #tpu.memory_space<vmem>>, vector<1x1x128xf32>
    %115 = vector.shape_cast %114 : vector<1x1x128xf32> to vector<1x128xf32>
    %c0_47 = arith.constant 0 : index
    %c0_48 = arith.constant 0 : index
    %c0_49 = arith.constant 0 : index
    %116 = vector.load %arg10[%c0_47, %c0_48, %c0_49] : memref<1x1x128xf32, #tpu.memory_space<vmem>>, vector<1x1x128xf32>
    %117 = vector.shape_cast %116 : vector<1x1x128xf32> to vector<1x128xf32>
    %cst_50 = arith.constant dense<0.000000e+00> : vector<32xf32>
    %118 = vector.multi_reduction <add>, %113, %cst_50 [1] : vector<32x128xf32> to vector<32xf32>
    %119 = vector.shape_cast %118 : vector<32xf32> to vector<32x1xf32>
    %cst_51 = arith.constant 1.280000e+02 : f32
    %120 = vector.broadcast %cst_51 : f32 to vector<32x1xf32>
    %121 = arith.divf %119, %120 : vector<32x1xf32>
    %122 = vector.broadcast %121 : vector<32x1xf32> to vector<32x128xf32>
    %123 = arith.subf %113, %122 : vector<32x128xf32>
    %124 = arith.mulf %123, %123 : vector<32x128xf32>
    %cst_52 = arith.constant dense<0.000000e+00> : vector<32xf32>
    %125 = vector.multi_reduction <add>, %124, %cst_52 [1] : vector<32x128xf32> to vector<32xf32>
    %126 = vector.shape_cast %125 : vector<32xf32> to vector<32x1xf32>
    %cst_53 = arith.constant 1.280000e+02 : f32
    %127 = vector.broadcast %cst_53 : f32 to vector<32x1xf32>
    %128 = arith.divf %126, %127 : vector<32x1xf32>
    %cst_54 = arith.constant 9.99999996E-13 : f32
    %129 = vector.broadcast %cst_54 : f32 to vector<32x1xf32>
    %130 = arith.addf %128, %129 : vector<32x1xf32>
    %131 = math.rsqrt %130 : vector<32x1xf32>
    %132 = vector.broadcast %131 : vector<32x1xf32> to vector<32x128xf32>
    %133 = arith.mulf %123, %132 : vector<32x128xf32>
    %134 = vector.broadcast %115 : vector<1x128xf32> to vector<32x128xf32>
    %135 = arith.mulf %133, %134 : vector<32x128xf32>
    %136 = vector.broadcast %117 : vector<1x128xf32> to vector<32x128xf32>
    %137 = arith.addf %135, %136 : vector<32x128xf32>
    %138 = arith.truncf %137 : vector<32x128xf32> to vector<32x128xbf16>
    %c0_55 = arith.constant 0 : index
    %c0_56 = arith.constant 0 : index
    %c0_57 = arith.constant 0 : index
    %139 = vector.load %arg11[%c0_55, %c0_56, %c0_57] : memref<1x128x256xbf16, #tpu.memory_space<vmem>>, vector<1x128x256xbf16>
    %140 = vector.shape_cast %139 : vector<1x128x256xbf16> to vector<128x256xbf16>
    %cst_58 = arith.constant dense<0.000000e+00> : vector<32x256xf32>
    %141 = tpu.matmul %138, %140, %cst_58 {dimension_numbers = #tpu.dot_dimension_numbers<[1], [0], [0], [1], [0, 0, 1, 1], [], []>} : vector<32x128xbf16>, vector<128x256xbf16>, vector<32x256xf32> -> vector<32x256xf32>
    %c0_59 = arith.constant 0 : index
    %c0_60 = arith.constant 0 : index
    %c0_61 = arith.constant 0 : index
    %142 = vector.load %arg12[%c0_59, %c0_60, %c0_61] : memref<1x1x256xf32, #tpu.memory_space<vmem>>, vector<1x1x256xf32>
    %143 = vector.shape_cast %142 : vector<1x1x256xf32> to vector<1x256xf32>
    %144 = vector.broadcast %143 : vector<1x256xf32> to vector<32x256xf32>
    %145 = arith.addf %141, %144 : vector<32x256xf32>
    %cst_62 = arith.constant 5.000000e-01 : f32
    %146 = vector.broadcast %cst_62 : f32 to vector<32x256xf32>
    %147 = arith.mulf %146, %145 : vector<32x256xf32>
    %cst_63 = arith.constant 4.471500e-02 : f32
    %148 = vector.broadcast %cst_63 : f32 to vector<32x256xf32>
    %149 = arith.mulf %148, %145 : vector<32x256xf32>
    %150 = arith.mulf %149, %145 : vector<32x256xf32>
    %151 = arith.mulf %150, %145 : vector<32x256xf32>
    %152 = arith.addf %145, %151 : vector<32x256xf32>
    %cst_64 = arith.constant 0.797884583 : f32
    %153 = vector.broadcast %cst_64 : f32 to vector<32x256xf32>
    %154 = arith.mulf %153, %152 : vector<32x256xf32>
    %155 = math.tanh %154 : vector<32x256xf32>
    %cst_65 = arith.constant 1.000000e+00 : f32
    %156 = vector.broadcast %cst_65 : f32 to vector<32x256xf32>
    %157 = arith.addf %156, %155 : vector<32x256xf32>
    %158 = arith.mulf %147, %157 : vector<32x256xf32>
    %159 = arith.truncf %158 : vector<32x256xf32> to vector<32x256xbf16>
    %c0_66 = arith.constant 0 : index
    %c0_67 = arith.constant 0 : index
    %c0_68 = arith.constant 0 : index
    %160 = vector.load %arg13[%c0_66, %c0_67, %c0_68] : memref<1x256x128xbf16, #tpu.memory_space<vmem>>, vector<1x256x128xbf16>
    %161 = vector.shape_cast %160 : vector<1x256x128xbf16> to vector<256x128xbf16>
    %cst_69 = arith.constant dense<0.000000e+00> : vector<32x128xf32>
    %162 = tpu.matmul %159, %161, %cst_69 {dimension_numbers = #tpu.dot_dimension_numbers<[1], [0], [0], [1], [0, 0, 1, 1], [], []>} : vector<32x256xbf16>, vector<256x128xbf16>, vector<32x128xf32> -> vector<32x128xf32>
    %c0_70 = arith.constant 0 : index
    %c0_71 = arith.constant 0 : index
    %c0_72 = arith.constant 0 : index
    %163 = vector.load %arg14[%c0_70, %c0_71, %c0_72] : memref<1x1x128xf32, #tpu.memory_space<vmem>>, vector<1x1x128xf32>
    %164 = vector.shape_cast %163 : vector<1x1x128xf32> to vector<1x128xf32>
    %165 = vector.broadcast %164 : vector<1x128xf32> to vector<32x128xf32>
    %166 = arith.addf %162, %165 : vector<32x128xf32>
    %167 = arith.addf %137, %166 : vector<32x128xf32>
    %c0_73 = arith.constant 0 : index
    %c0_74 = arith.constant 0 : index
    %c0_75 = arith.constant 0 : index
    %168 = vector.load %arg15[%c0_73, %c0_74, %c0_75] : memref<1x1x128xf32, #tpu.memory_space<vmem>>, vector<1x1x128xf32>
    %169 = vector.shape_cast %168 : vector<1x1x128xf32> to vector<1x128xf32>
    %c0_76 = arith.constant 0 : index
    %c0_77 = arith.constant 0 : index
    %c0_78 = arith.constant 0 : index
    %170 = vector.load %arg16[%c0_76, %c0_77, %c0_78] : memref<1x1x128xf32, #tpu.memory_space<vmem>>, vector<1x1x128xf32>
    %171 = vector.shape_cast %170 : vector<1x1x128xf32> to vector<1x128xf32>
    %cst_79 = arith.constant dense<0.000000e+00> : vector<32xf32>
    %172 = vector.multi_reduction <add>, %167, %cst_79 [1] : vector<32x128xf32> to vector<32xf32>
    %173 = vector.shape_cast %172 : vector<32xf32> to vector<32x1xf32>
    %cst_80 = arith.constant 1.280000e+02 : f32
    %174 = vector.broadcast %cst_80 : f32 to vector<32x1xf32>
    %175 = arith.divf %173, %174 : vector<32x1xf32>
    %176 = vector.broadcast %175 : vector<32x1xf32> to vector<32x128xf32>
    %177 = arith.subf %167, %176 : vector<32x128xf32>
    %178 = arith.mulf %177, %177 : vector<32x128xf32>
    %cst_81 = arith.constant dense<0.000000e+00> : vector<32xf32>
    %179 = vector.multi_reduction <add>, %178, %cst_81 [1] : vector<32x128xf32> to vector<32xf32>
    %180 = vector.shape_cast %179 : vector<32xf32> to vector<32x1xf32>
    %cst_82 = arith.constant 1.280000e+02 : f32
    %181 = vector.broadcast %cst_82 : f32 to vector<32x1xf32>
    %182 = arith.divf %180, %181 : vector<32x1xf32>
    %cst_83 = arith.constant 9.99999996E-13 : f32
    %183 = vector.broadcast %cst_83 : f32 to vector<32x1xf32>
    %184 = arith.addf %182, %183 : vector<32x1xf32>
    %185 = math.rsqrt %184 : vector<32x1xf32>
    %186 = vector.broadcast %185 : vector<32x1xf32> to vector<32x128xf32>
    %187 = arith.mulf %177, %186 : vector<32x128xf32>
    %188 = vector.broadcast %169 : vector<1x128xf32> to vector<32x128xf32>
    %189 = arith.mulf %187, %188 : vector<32x128xf32>
    %190 = vector.broadcast %171 : vector<1x128xf32> to vector<32x128xf32>
    %191 = arith.addf %189, %190 : vector<32x128xf32>
    %c0_84 = arith.constant 0 : index
    %c0_85 = arith.constant 0 : index
    %192 = vector.load %arg22[%c0_84, %c0_85] : memref<32x128xf32, #tpu.memory_space<vmem>>, vector<32x128xf32>
    tpu.vector_store %arg22[%c0_84, %c0_85], %191 {strides = array<i32>} : memref<32x128xf32, #tpu.memory_space<vmem>>, vector<32x128xf32>,
    %c1_i32 = arith.constant 1 : i32
    %193 = arith.cmpi eq, %arg0, %c1_i32 : i32
    %194 = arith.extui %193 : i1 to i32
    %c0_i32_86 = arith.constant 0 : i32
    %195 = arith.cmpi ne, %194, %c0_i32_86 : i32
    scf.if %195 {
      %196 = vector.extract_strided_slice %191 {offsets = [0, 0], sizes = [1, 128], strides = [1, 1]} : vector<32x128xf32> to vector<1x128xf32>
      %197 = vector.extract_strided_slice %191 {offsets = [16, 0], sizes = [1, 128], strides = [1, 1]} : vector<32x128xf32> to vector<1x128xf32>
      %198 = tpu.concatenate %196, %197 in 0 : vector<1x128xf32>, vector<1x128xf32> -> vector<2x128xf32>
      %199 = arith.truncf %198 : vector<2x128xf32> to vector<2x128xbf16>
      %c0_87 = arith.constant 0 : index
      %c0_88 = arith.constant 0 : index
      %200 = vector.load %arg17[%c0_87, %c0_88] : memref<128x128xbf16, #tpu.memory_space<vmem>>, vector<128x128xbf16>
      %cst_89 = arith.constant dense<0.000000e+00> : vector<2x128xf32>
      %201 = tpu.matmul %199, %200, %cst_89 {dimension_numbers = #tpu.dot_dimension_numbers<[1], [0], [0], [1], [0, 0, 1, 1], [], []>} : vector<2x128xbf16>, vector<128x128xbf16>, vector<2x128xf32> -> vector<2x128xf32>
      %c0_90 = arith.constant 0 : index
      %c0_91 = arith.constant 0 : index
      %202 = vector.load %arg18[%c0_90, %c0_91] : memref<1x128xf32, #tpu.memory_space<vmem>>, vector<1x128xf32>
      %203 = vector.broadcast %202 : vector<1x128xf32> to vector<2x128xf32>
      %204 = arith.addf %201, %203 : vector<2x128xf32>
      %205 = math.tanh %204 : vector<2x128xf32>
      %206 = arith.truncf %205 : vector<2x128xf32> to vector<2x128xbf16>
      %c0_92 = arith.constant 0 : index
      %c0_93 = arith.constant 0 : index
      %207 = vector.load %arg19[%c0_92, %c0_93] : memref<128x128xbf16, #tpu.memory_space<vmem>>, vector<128x128xbf16>
      %cst_94 = arith.constant dense<0.000000e+00> : vector<2x128xf32>
      %208 = tpu.matmul %206, %207, %cst_94 {dimension_numbers = #tpu.dot_dimension_numbers<[1], [0], [0], [1], [0, 0, 1, 1], [], []>} : vector<2x128xbf16>, vector<128x128xbf16>, vector<2x128xf32> -> vector<2x128xf32>
      %c0_95 = arith.constant 0 : index
      %c0_96 = arith.constant 0 : index
      %209 = vector.load %arg20[%c0_95, %c0_96] : memref<1x128xf32, #tpu.memory_space<vmem>>, vector<1x128xf32>
      %210 = vector.broadcast %209 : vector<1x128xf32> to vector<2x128xf32>
      %211 = arith.addf %208, %210 : vector<2x128xf32>
      %c0_97 = arith.constant 0 : index
      %c0_98 = arith.constant 0 : index
      %212 = vector.load %arg21[%c0_97, %c0_98] : memref<2x128xf32, #tpu.memory_space<vmem>>, vector<2x128xf32>
      tpu.vector_store %arg21[%c0_97, %c0_98], %211 {strides = array<i32>} : memref<2x128xf32, #tpu.memory_space<vmem>>, vector<2x128xf32>,
    } else {
    }
    return
  }
  func.func @transform_0(%arg0: i32) -> (i32, i32) {
    %c0_i32 = arith.constant 0 : i32
    %c0_i32_0 = arith.constant 0 : i32
    %c0_i32_1 = arith.constant 0 : i32
    return %c0_i32, %c0_i32_0 : i32, i32
  }
  func.func @transform_1(%arg0: i32) -> (i32, i32, i32) {
    %c0_i32 = arith.constant 0 : i32
    %c0_i32_0 = arith.constant 0 : i32
    %c0_i32_1 = arith.constant 0 : i32
    %c0_i32_2 = arith.constant 0 : i32
    return %c0_i32, %c0_i32_0, %c0_i32_1 : i32, i32, i32
  }
  func.func @transform_2(%arg0: i32) -> (i32, i32) {
    %c0_i32 = arith.constant 0 : i32
    %c0_i32_0 = arith.constant 0 : i32
    %c0_i32_1 = arith.constant 0 : i32
    return %c0_i32, %c0_i32_0 : i32, i32
  }
  func.func @transform_3(%arg0: i32) -> (i32, i32) {
    %c0_i32 = arith.constant 0 : i32
    %c0_i32_0 = arith.constant 0 : i32
    %c0_i32_1 = arith.constant 0 : i32
    return %c0_i32, %c0_i32_0 : i32, i32
  }
  func.func @transform_4(%arg0: i32) -> (i32, i32, i32) {
    %c0_i32 = arith.constant 0 : i32
    %c0_i32_0 = arith.constant 0 : i32
    %c0_i32_1 = arith.constant 0 : i32
    return %arg0, %c0_i32, %c0_i32_0 : i32, i32, i32
  }
  func.func @transform_5(%arg0: i32) -> (i32, i32, i32) {
    %c0_i32 = arith.constant 0 : i32
    %c0_i32_0 = arith.constant 0 : i32
    %c0_i32_1 = arith.constant 0 : i32
    return %arg0, %c0_i32, %c0_i32_0 : i32, i32, i32
  }
  func.func @transform_6(%arg0: i32) -> (i32, i32, i32) {
    %c0_i32 = arith.constant 0 : i32
    %c0_i32_0 = arith.constant 0 : i32
    %c0_i32_1 = arith.constant 0 : i32
    return %arg0, %c0_i32, %c0_i32_0 : i32, i32, i32
  }
  func.func @transform_7(%arg0: i32) -> (i32, i32, i32) {
    %c0_i32 = arith.constant 0 : i32
    %c0_i32_0 = arith.constant 0 : i32
    %c0_i32_1 = arith.constant 0 : i32
    return %arg0, %c0_i32, %c0_i32_0 : i32, i32, i32
  }
  func.func @transform_8(%arg0: i32) -> (i32, i32, i32) {
    %c0_i32 = arith.constant 0 : i32
    %c0_i32_0 = arith.constant 0 : i32
    %c0_i32_1 = arith.constant 0 : i32
    return %arg0, %c0_i32, %c0_i32_0 : i32, i32, i32
  }
  func.func @transform_9(%arg0: i32) -> (i32, i32, i32) {
    %c0_i32 = arith.constant 0 : i32
    %c0_i32_0 = arith.constant 0 : i32
    %c0_i32_1 = arith.constant 0 : i32
    return %arg0, %c0_i32, %c0_i32_0 : i32, i32, i32
  }
  func.func @transform_10(%arg0: i32) -> (i32, i32, i32) {
    %c0_i32 = arith.constant 0 : i32
    %c0_i32_0 = arith.constant 0 : i32
    %c0_i32_1 = arith.constant 0 : i32
    return %arg0, %c0_i32, %c0_i32_0 : i32, i32, i32
  }
  func.func @transform_11(%arg0: i32) -> (i32, i32, i32) {
    %c0_i32 = arith.constant 0 : i32
    %c0_i32_0 = arith.constant 0 : i32
    %c0_i32_1 = arith.constant 0 : i32
    return %arg0, %c0_i32, %c0_i32_0 : i32, i32, i32
  }
  func.func @transform_12(%arg0: i32) -> (i32, i32, i32) {
    %c0_i32 = arith.constant 0 : i32
    %c0_i32_0 = arith.constant 0 : i32
    %c0_i32_1 = arith.constant 0 : i32
    return %arg0, %c0_i32, %c0_i32_0 : i32, i32, i32
  }
  func.func @transform_13(%arg0: i32) -> (i32, i32, i32) {
    %c0_i32 = arith.constant 0 : i32
    %c0_i32_0 = arith.constant 0 : i32
    %c0_i32_1 = arith.constant 0 : i32
    return %arg0, %c0_i32, %c0_i32_0 : i32, i32, i32
  }
  func.func @transform_14(%arg0: i32) -> (i32, i32, i32) {
    %c0_i32 = arith.constant 0 : i32
    %c0_i32_0 = arith.constant 0 : i32
    %c0_i32_1 = arith.constant 0 : i32
    return %arg0, %c0_i32, %c0_i32_0 : i32, i32, i32
  }
  func.func @transform_15(%arg0: i32) -> (i32, i32, i32) {
    %c0_i32 = arith.constant 0 : i32
    %c0_i32_0 = arith.constant 0 : i32
    %c0_i32_1 = arith.constant 0 : i32
    return %arg0, %c0_i32, %c0_i32_0 : i32, i32, i32
  }
  func.func @transform_16(%arg0: i32) -> (i32, i32) {
    %c0_i32 = arith.constant 0 : i32
    %c0_i32_0 = arith.constant 0 : i32
    %c0_i32_1 = arith.constant 0 : i32
    return %c0_i32, %c0_i32_0 : i32, i32
  }
  func.func @transform_17(%arg0: i32) -> (i32, i32) {
    %c0_i32 = arith.constant 0 : i32
    %c0_i32_0 = arith.constant 0 : i32
    %c0_i32_1 = arith.constant 0 : i32
    return %c0_i32, %c0_i32_0 : i32, i32
  }
  func.func @transform_18(%arg0: i32) -> (i32, i32) {
    %c0_i32 = arith.constant 0 : i32
    %c0_i32_0 = arith.constant 0 : i32
    %c0_i32_1 = arith.constant 0 : i32
    return %c0_i32, %c0_i32_0 : i32, i32
  }
  func.func @transform_19(%arg0: i32) -> (i32, i32) {
    %c0_i32 = arith.constant 0 : i32
    %c0_i32_0 = arith.constant 0 : i32
    %c0_i32_1 = arith.constant 0 : i32
    return %c0_i32, %c0_i32_0 : i32, i32
  }
  func.func @transform_20(%arg0: i32) -> (i32, i32) {
    %c0_i32 = arith.constant 0 : i32
    %c0_i32_0 = arith.constant 0 : i32
    %c0_i32_1 = arith.constant 0 : i32
    return %c0_i32, %c0_i32_0 : i32, i32
  }
}

</mosaic_0001>

<bundles_post_ra>
// kernel: bert_classifier_forward.1
= control target key start
LH: loop header
LB: loop body
LE: loop exit
PB: predicated region body
PF: predicated region fallthrough
CT: control target
= control target key end

     0   :  { %s4604_s0 = inlined_call_operand.vmem [shape: f32[32,128], index: 0, kind: input, shape index: {}]   ;;  %s4605_s1 = inlined_call_operand.vmem [shape: f32[2,1,16], index: 1, kind: input, shape index: {}]   ;;  %s4606_s2 = inlined_call_operand.vmem [shape: f32[1,128], index: 2, kind: input, shape index: {}]   ;;  %s4607_s3 = inlined_call_operand.vmem [shape: f32[1,128], index: 3, kind: input, shape index: {}]   ;;  %s4608_s4 = inlined_call_operand.hbm [shape: bf16[2,128,768], index: 4, kind: input, shape index: {}]   ;;  %s4609_s5 = inlined_call_operand.vmem [shape: f32[2,1,768], index: 5, kind: input, shape index: {}]   ;;  %s4610_s6 = inlined_call_operand.vmem [shape: bf16[2,256,128], index: 6, kind: input, shape index: {}]   ;;  %s4611_s7 = inlined_call_operand.vmem [shape: f32[2,1,128], index: 7, kind: input, shape index: {}]   ;;  %s4612_s8 = inlined_call_operand.vmem [shape: f32[2,1,128], index: 8, kind: input, shape index: {}]   ;;  %s4613_s9 = inlined_call_operand.vmem [shape: f32[2,1,128], index: 9, kind: input, shape index: {}]   ;;  %s4614_s10 = inlined_call_operand.vmem [shape: bf16[2,128,256], index: 10, kind: input, shape index: {}]   ;;  %s4615_s11 = inlined_call_operand.vmem [shape: f32[2,1,256], index: 11, kind: input, shape index: {}]   ;;  %s4616_s12 = inlined_call_operand.hbm [shape: bf16[2,256,128], index: 12, kind: input, shape index: {}]   ;;  %s4617_s13 = inlined_call_operand.vmem [shape: f32[2,1,128], index: 13, kind: input, shape index: {}]   ;;  %s4618_s14 = inlined_call_operand.vmem [shape: f32[2,1,128], index: 14, kind: input, shape index: {}]   ;;  %s4619_s15 = inlined_call_operand.vmem [shape: f32[2,1,128], index: 15, kind: input, shape index: {}]   ;;  %s4620_s16 = inlined_call_operand.vmem [shape: bf16[128,128], index: 16, kind: input, shape index: {}]   ;;  %s4621_s17 = inlined_call_operand.vmem [shape: f32[1,128], index: 17, kind: input, shape index: {}]   ;;  %s4622_s18 = inlined_call_operand.hbm [shape: bf16[128,128], index: 18, kind: input, shape index: {}]   ;;  %s4623_s19 = inlined_call_operand.vmem [shape: f32[1,128], index: 19, kind: input, shape index: {}]   ;;  %s4624_s20 = inlined_call_operand.hbm [shape: f32[2,128], index: 20, kind: output, shape index: {}]  }
   0x1   :  { %4639 = sst [smem:[#allocation18_spill]] %s4604_s0 }
   0x2   :  { %4640 = sst [smem:[#allocation19_spill]] %s4605_s1 }
   0x3   :  { %4641 = sst [smem:[#allocation20_spill]] %s4606_s2 }
   0x4   :  { %4642 = sst [smem:[#allocation21_spill]] %s4607_s3 }
   0x5   :  { %4643 = sst [smem:[#allocation22_spill]] %s4608_s4 }
   0x6   :  { %4644 = sst [smem:[#allocation23_spill]] %s4609_s5 }
   0x7   :  { %4645 = sst [smem:[#allocation24_spill]] %s4610_s6 }
   0x8   :  { %4646 = sst [smem:[#allocation25_spill]] %s4616_s12 }
   0x9   :  { %4647 = sst [smem:[#allocation26_spill]] %s4618_s14 }
   0xa   :  { %4648 = sst [smem:[#allocation27_spill]] %s4619_s15 }
   0xb   :  { %4649 = sst [smem:[#allocation28_spill]] %s4620_s16 }
   0xc   :  { %4650 = sst [smem:[#allocation29_spill]] %s4621_s17 }
   0xd   :  { %4651 = sst [smem:[#allocation30_spill]] %s4622_s18 }
   0xe   :  { %4652 = sst [smem:[#allocation31_spill]] %s4623_s19 }
   0xf   :  { %4653 = sst [smem:[#allocation32_spill]] %s4624_s20 }
  0x10   :  { %25 = vsyncpa [#allocation5], 0 }
  0x11   :  { %27 = vsyncpa [#allocation5 + $0x1], 0 }
  0x12   :  { %28 = vsyncpa [#allocation8], 0 }
  0x13   :  { %30 = vsyncpa [#allocation8 + $0x1], 0 }
  0x14   :  { %31 = vsyncpa [#allocation6], 0  ;;  %s3992_s1 = smov 0   ;;  %s3994_s22 = smov 0  }
  0x15   :  { %s3996_s23 = smov 0   ;;  %s3998_s24 = smov 0  }
  0x16 LB: > { %4654 = sst [smem:[#allocation15_spill]] %s3868_s23  ;;  %s4011_s2 = sadd.s32 4294967295, %s3872_s24   ;;  %s3872_s24 = sphi %s3998_s24, %s4691_s24   ;;  %s3868_s23 = sphi %s3996_s23, %s4693_s23   ;;  %s3864_s22 = sphi %s3994_s22, %s4695_s22   ;;  %s3860_s1 = sphi %s3992_s1, %s4694_s1  }
  0x17   : > { %p141_p0 = scmp.ne.s32.totalorder %s3864_s22, %s3860_s1  ;;  %p4630_p1 = scmp.eq.s32.totalorder %s4011_s2, 0 }
  0x18   : > { %p3072_p2 = scmp.ge.s32.totalorder %s3872_s24, 1  ;;  %p543_p3 = scmp.lt.s32.totalorder %s3872_s24, 3 }
  0x19   : > { %p4020_p5 = por %p4630_p1, %p141_p0  ;;  %s3874_s26 = smov [#allocation9]  }
  0x1a   : > { %p4024_p6 = pnand %p3072_p2, %p543_p3  ;;  %s573_s27 = sshll.u32 %s3874_s26, 4  ;;  %s574_s27 = int_to_ptr.vmem [resolvable:$true] %s573_s27 }
  0x1b   : > { %s4655_s25 = scalar_select %p4020_p5, 1, 0 }
  0x1c   : > { %s4656_s3 = scalar_select %p4024_p6, 1, 0 }
  0x1d   : > { %p3435_p7 = pneg %p4024_p6  ;;  %s4037_s4 = sadd.s32 1, %s3872_s24  }
  0x1e   : > { %4658 = sst [smem:[#allocation16_spill]] %s4037_s4  ;;  %s128_s29 = sadd.s32 1, %s3868_s23 }
  0x1f   : > { %p4032_p8 = pnand %p3435_p7, %p4630_p1  ;;  %s125_s30 = ssub.s32 %s3872_s24, %s4037_s4 }
  0x20   : > { %s4659_s18 = sld [smem:[#allocation30_spill]] }
  0x21   : > { %p3714_p10 = pneg %p4032_p8 }
  0x26   : > { %s3712_s1 = scalar_lea.hbm %s4659_s18, 1024 }
  0x27   : > { %p3713_p9 = scmp.ne.s32.totalorder %s4659_s18, %s3712_s1  ;;  %p3719_p13 = scmp.lt.u32.totalorder %s3712_s1, %s4659_s18 }
  0x29   : > { %p3715_p11 = pnand %p3714_p10, %p3713_p9 }
  0x2b   : > { %p3716_p12 = pneg %p3715_p11 }
  0x2d   : > { %p3721_p0 = pnand %p3719_p13, %p3716_p12 }
  0x2f   : > { %3724 = shalt.err (!%p3721_p0)
}
  0x30   : > { %s3725_s16 = scalar_lea.vmem %s574_s27, 1024  ;;  %p3733_p4 = scmp.lt.s32.totalorder %s574_s27, %s574_s27 }
  0x31   : > { %p3726_p2 = scmp.ne.s32.totalorder %s574_s27, %s3725_s16  ;;  %p3734_p1 = scmp.lt.s32.totalorder %s3725_s16, %s3725_s16 }
  0x33   : > { %p3728_p3 = pnand %p3726_p2, %p3714_p10  ;;  %p3735_p5 = por %p3734_p1, %p3733_p4 }
  0x35   : > { %p3729_p7 = pneg %p3728_p3 }
  0x37   : > { %p3736_p6 = pnand %p3735_p5, %p3729_p7 }
  0x39   : > { %3739 = shalt.err (!%p3736_p6)
}
  0x3a   : > { %s4633_s20 = smov 64   ;;  %s4634_s17 = smov 4  }
  0x3b   : > { %3438 = dma.hbm_to_vmem [thread:$0]  (!%p4032_p8), %s4659_s18, 1024, %s574_s27, [#allocation8], %s4633_s20, %s4633_s20, %s4634_s17  }
  0x3c   : > { %p126_p1 = scmp.eq.s32.totalorder %s125_s30, 0  ;;  %p135_p4 = scmp.ne.s32.totalorder %s3868_s23, %s3864_s22 }
  0x3d   : > { %p136_p5 = scmp.eq.s32.totalorder %s3872_s24, 0  ;;  %p3447_p6 = scmp.lt.s32.totalorder %s3872_s24, 2 }
  0x3e   : > { %s4066_s16 = scalar_select %p126_p1, %s3868_s23, %s128_s29  }
  0x3f   : > { %p137_p9 = por %p136_p5, %p135_p4  ;;  %s4069_s21 = sand.u32 1, %s3868_s23  }
  0x40   : > { %4660 = sst [smem:[#allocation17_spill]] %s4066_s16  ;;  %s3419_s28 = smul.u32 384, %s4069_s21 }
  0x41   : > { %s3420_s1 = smul.u32 6144, %s3872_s24  ;;  %p4073_p10 = pnand %p3447_p6, %p137_p9 }
  0x42   : > { %s4662_s27 = sld [smem:[#allocation22_spill]]  ;;  %s594_s29 = scalar_lea.vmem [#allocation4], %s3419_s28 }
  0x43   : > { %s601_s20 = sshll.u32 %s594_s29, 4  ;;  %s591_s18 = scalar_lea.sflag [#allocation5], %s4069_s21  ;;  %s4082_s20 = int_to_ptr.vmem [resolvable:$true] %s601_s20 }
  0x44   : > { %p3742_p11 = pneg %p4073_p10 }
  0x48   : > { %s4080_s30 = scalar_lea.hbm %s4662_s27, %s3420_s1  ;;  %s3745_s0 = scalar_lea.hbm %s4662_s27, 12288 }
  0x49   : > { %s3740_s16 = scalar_lea.hbm %s4080_s30, 6144  ;;  %p3746_p0 = scmp.lt.u32.totalorder %s4080_s30, %s4662_s27 }
  0x4a   : > { %p3741_p8 = scmp.ne.s32.totalorder %s4080_s30, %s3740_s16  ;;  %p3747_p2 = scmp.lt.u32.totalorder %s3745_s0, %s3740_s16 }
  0x4b   : > { %p3749_p7 = scmp.lt.u32.totalorder %s3740_s16, %s4080_s30 }
  0x4c   : > { %p3743_p12 = pnand %p3742_p11, %p3741_p8  ;;  %p3748_p3 = por %p3747_p2, %p3746_p0 }
  0x4e   : > { %p3744_p13 = pneg %p3743_p12  ;;  %p3750_p1 = por %p3749_p7, %p3748_p3 }
  0x50   : > { %p3751_p4 = pnand %p3750_p1, %p3744_p13 }
  0x52   : > { %3754 = shalt.err (!%p3751_p4)
}
  0x53   : > { %s3755_s28 = scalar_lea.vmem %s4082_s20, 6144  ;;  %s3877_s29 = smov [#allocation4]  }
  0x54   : > { %p3756_p5 = scmp.ne.s32.totalorder %s4082_s20, %s3755_s28  ;;  %s3760_s1 = sshll.u32 %s3877_s29, 4  ;;  %s3761_s1 = int_to_ptr.vmem [resolvable:$false] %s3760_s1 }
  0x55   : > { %s3762_s23 = scalar_lea.vmem %s3761_s1, 12288  ;;  %p3763_p8 = scmp.lt.s32.totalorder %s4082_s20, %s3761_s1 }
  0x56   : > { %p3758_p6 = pnand %p3756_p5, %p3742_p11  ;;  %p3764_p12 = scmp.lt.s32.totalorder %s3762_s23, %s3755_s28 }
  0x58   : > { %p3759_p9 = pneg %p3758_p6  ;;  %p3765_p0 = por %p3764_p12, %p3763_p8 }
  0x5a   : > { %p3766_p2 = pnand %p3765_p0, %p3759_p9 }
  0x5c   : > { %3769 = shalt.err (!%p3766_p2)
}
  0x5d   : > { %s3878_s4 = smov 384   ;;  %s3879_s16 = smov 24  }
  0x5e   : > { %3442 = dma.hbm_to_vmem [thread:$0]  (!%p4073_p10), %s4080_s30, 6144, %s4082_s20, %s591_s18, %s3878_s4, %s3878_s4, %s3879_s16  }
  0x5f   : > { %s3076_s19 = sshll.u32 %s4069_s21, 7  ;;  %s3222_s0 = sshll.u32 %s3872_s24, 11 }
  0x60   : > { %s4663_s12 = sld [smem:[#allocation25_spill]]  ;;  %s663_s23 = scalar_lea.vmem [#allocation7], %s3076_s19 }
  0x61   : > { %s670_s17 = sshll.u32 %s663_s23, 4  ;;  %s4664_s27 = sand.u32 1, %s3872_s24   ;;  %s4120_s17 = int_to_ptr.vmem [resolvable:$true] %s670_s17 }
  0x62   : > { %s4124_s15 = scalar_lea.sflag [#allocation8], %s4664_s27 }
  0x66   : > { %s4118_s1 = scalar_lea.hbm %s4663_s12, %s3222_s0  ;;  %s3775_s21 = scalar_lea.hbm %s4663_s12, 4096 }
  0x67   : > { %s3770_s14 = scalar_lea.hbm %s4118_s1, 2048  ;;  %p3776_p1 = scmp.lt.u32.totalorder %s4118_s1, %s4663_s12 }
  0x68   : > { %p3771_p13 = scmp.ne.s32.totalorder %s4118_s1, %s3770_s14  ;;  %p3777_p4 = scmp.lt.u32.totalorder %s3775_s21, %s3770_s14 }
  0x69   : > { %p3779_p6 = scmp.lt.u32.totalorder %s3770_s14, %s4118_s1 }
  0x6a   : > { %p3773_p3 = pnand %p3771_p13, %p3742_p11  ;;  %p3778_p5 = por %p3777_p4, %p3776_p1 }
  0x6c   : > { %p3774_p7 = pneg %p3773_p3  ;;  %p3780_p9 = por %p3779_p6, %p3778_p5 }
  0x6e   : > { %p3781_p8 = pnand %p3780_p9, %p3774_p7 }
  0x70   : > { %3784 = shalt.err (!%p3781_p8)
}
  0x71   : > { %s3785_s24 = scalar_lea.vmem %s4120_s17, 2048  ;;  %s3880_s27 = smov [#allocation7]  }
  0x72   : > { %p3786_p12 = scmp.ne.s32.totalorder %s4120_s17, %s3785_s24  ;;  %s3790_s16 = sshll.u32 %s3880_s27, 4  ;;  %s3791_s16 = int_to_ptr.vmem [resolvable:$false] %s3790_s16 }
  0x73   : > { %s3792_s19 = scalar_lea.vmem %s3791_s16, 4096  ;;  %p3793_p13 = scmp.lt.s32.totalorder %s4120_s17, %s3791_s16 }
  0x74   : > { %p3788_p0 = pnand %p3786_p12, %p3742_p11  ;;  %p3794_p3 = scmp.lt.s32.totalorder %s3792_s19, %s3785_s24 }
  0x76   : > { %p3789_p2 = pneg %p3788_p0  ;;  %p3795_p1 = por %p3794_p3, %p3793_p13 }
  0x78   : > { %p3796_p4 = pnand %p3795_p1, %p3789_p2 }
  0x7a   : > { %3799 = shalt.err (!%p3796_p4)
}
  0x7b   : > { %s4665_s14 = smov 4   ;;  %s4666_s0 = smov 64  }
  0x7c   : > { %3445 = dma.hbm_to_vmem [thread:$0]  (!%p4073_p10), %s4118_s1, 2048, %s4120_s17, %s4124_s15, %s4666_s0, %s4666_s0, %s4665_s14  }
  0x7d   : > { %p4667_p11 = scmp.ne.s32.totalorder %s4656_s3, 0 }
  0x7e   : > { %s702_s29 = sand.u32 (!%p4667_p11), 1, %s3864_s22   ;;  %p4668_p7 = scmp.ne.s32.totalorder (!%p4667_p11), %s4655_s25, 0 }
  0x7f   : > { %700 = sbr.rel (%p4667_p11) target bundleno = 3830 (0xef6), region = 100  ;;  %s703_s23 = scalar_lea.sflag (!%p4667_p11), [#allocation5], %s702_s29 }
  0x80   : > { %s3421_s28 = smul.u32 (!%p4667_p11), 384, %s702_s29 }
  0x82   : > { %s4156_s18 = scalar_lea.vmem (!%p4667_p11), [#allocation4], %s3421_s28 }
  0x86   : > { %3843 = dma.done.wait (%p4668_p7), %s703_s23, 6144  }
  0x87   : > { %3845 = vsyncadd (%p4668_p7), %s703_s23, 4294961152  ;;  %s711_s26 = sand.u32 1, %s4011_s2   ;;  %s3080_s20 = sshll.u32 %s702_s29, 7 }
  0x88   : > { %s712_s15 = scalar_lea.sflag [#allocation8], %s711_s26  ;;  %s4163_s17 = scalar_lea.vmem [#allocation7], %s3080_s20 }
  0x89   : > { %3847 = dma.done.wait (%p4668_p7), %s712_s15, 2048  }
  0x8a   : > { %3849 = vsyncadd (%p4668_p7), %s712_s15, 4294965248  ;;  %p4669_p10 = scmp.eq.s32.totalorder %s4011_s2, 0 }
  0x8c   : > { %3851 = dma.done.wait (%p4669_p10), [#allocation8], 1024   ;;  %p4670_p5 = pmov %p4669_p10 }
  0x8d   : > { %p812_p6 = scmp.lt.s32.totalorder %s4011_s2, 1  ;;  %s4671_s6 = sld [smem:[#allocation24_spill]] }
  0x8e   : > { %3853 = vsyncadd (%p4670_p5), [#allocation8], 4294966272  ;;  %s4672_s5 = sld [smem:[#allocation23_spill]]  ;;  %s4673_s23 = sld [smem:[#allocation26_spill]] }
  0x8f   : > { %s4175_s3 = scalar_select %p812_p6, %s4011_s2, 1 }
  0x90   : > { %s4674_s12 = sld [smem:[#allocation27_spill]]  ;;  %p4675_p9 = scmp.ne.s32.totalorder %s4011_s2, 0 }
  0x91   : > { %s3422_s25 = smul.u32 6, %s4175_s3  ;;  %s3223_s1 = sshll.u32 %s4175_s3, 7 }
  0x92   : > { %s3086_s24 = sshll.u32 %s4175_s3, 1  ;;  %852 = sbr.rel (%p4675_p9) target bundleno = 476 (0x1dc), region = 116 }
  0x93   : > { %s4182_s4 = scalar_lea.vmem %s4671_s6, %s3223_s1  ;;  %s4204_s6 = scalar_lea.vmem %s4614_s10, %s3223_s1 }
  0x94   : > { %s4191_s0 = scalar_lea.vmem %s4672_s5, %s3422_s25  ;;  %s4214_s5 = scalar_lea.vmem %s4615_s11, %s3086_s24 }
  0x95   : > { %s844_s26 = scalar_lea.vmem %s4673_s23, %s4175_s3  ;;  %s4676_s16 = sld [smem:[#allocation18_spill]] (!%p4675_p9) }
  0x96   : > { %s847_s21 = scalar_lea.vmem %s4674_s12, %s4175_s3  ;;  %s4677_s14 = sld [smem:[#allocation20_spill]] (!%p4675_p9) }
  0x97   : > { %s4678_s20 = sld [smem:[#allocation21_spill]] (!%p4675_p9) }
  0x9b   : > { %v853_v0 = vld [vmem:[%s4676_s16] sm:$0xff]  ;;  %v855_v1 = vld [vmem:[%s4676_s16 + $0x10] sm:$0xff]  ;;  %v854_v2 = vld [vmem:[%s4676_s16 + $0x8] sm:$0xff] }
  0x9c   : > { %859 = vadd.xlane.f32.xlu0 %v853_v0  ;;  %863 = vadd.xlane.f32.xlu1 %v855_v1  ;;  %v856_v3 = vld [vmem:[%s4676_s16 + $0x18] sm:$0xff]  ;;  %v3088_v33 = vld [vmem:[%s4677_s14] ss:$0 sm:$0xff] }
  0x9d   : > { %v3089_v35 = vld [vmem:[%s4678_s20] ss:$0 sm:$0xff] }
  0xa0   : > { %861 = vadd.xlane.f32.xlu0 %v854_v2  ;;  %865 = vadd.xlane.f32.xlu1 %v856_v3 }
 0x129   : > { %v860_v4 = vpop.xlane.xlu0 %859  ;;  %v864_v5 = vpop.xlane.xlu1 %863 }
 0x12a   : > { %v868_v6 = vmul.f32 0.0078125, %v860_v4  ;;  %v870_v7 = vmul.f32 0.0078125, %v864_v5 }
 0x12c   : > { %v872_v8 = vsub.f32 %v853_v0, %v868_v6  ;;  %v874_v9 = vsub.f32 %v855_v1, %v870_v7 }
 0x12d   : > { %v862_v10 = vpop.xlane.xlu0 %861  ;;  %v866_v11 = vpop.xlane.xlu1 %865 }
 0x12e   : > { %v869_v12 = vmul.f32 0.0078125, %v862_v10  ;;  %v876_v13 = vmul.f32 %v872_v8, %v872_v8  ;;  %v871_v14 = vmul.f32 0.0078125, %v866_v11  ;;  %v878_v17 = vmul.f32 %v874_v9, %v874_v9 }
 0x130   : > { %v873_v15 = vsub.f32 %v854_v2, %v869_v12  ;;  %880 = vadd.xlane.f32.xlu0 %v876_v13  ;;  %v875_v16 = vsub.f32 %v856_v3, %v871_v14 }
 0x132   : > { %v877_v18 = vmul.f32 %v873_v15, %v873_v15  ;;  %v879_v19 = vmul.f32 %v875_v16, %v875_v16 }
 0x134   : > { %884 = vadd.xlane.f32.xlu0 %v878_v17  ;;  %882 = vadd.xlane.f32.xlu1 %v877_v18 }
 0x138   : > { %886 = vadd.xlane.f32.xlu1 %v879_v19 }
 0x1bd   : > { %v881_v20 = vpop.xlane.xlu0 %880 }
 0x1be   : > { %v888_v21 = vmul.f32 0.0078125, %v881_v20 }
 0x1c0   : > { %v892_v22 = vadd.f32 1e-12, %v888_v21 }
 0x1c1   : > { %v883_v23 = vpop.xlane.xlu1 %882  ;;  %v885_v24 = vpop.xlane.xlu0 %884 }
 0x1c2   : > { %3494 = vrsqrt.f32 %v892_v22  ;;  %v889_v25 = vmul.f32 0.0078125, %v883_v23  ;;  %v890_v26 = vmul.f32 0.0078125, %v885_v24 }
 0x1c4   : > { %v893_v27 = vadd.f32 1e-12, %v889_v25  ;;  %v894_v28 = vadd.f32 1e-12, %v890_v26 }
 0x1c5   : > { %v887_v29 = vpop.xlane.xlu1 %886 }
 0x1c6   : > { %3496 = vrsqrt.f32 %v893_v27  ;;  %v891_v30 = vmul.f32 0.0078125, %v887_v29 }
 0x1c7   : > { %3498 = vrsqrt.f32 %v894_v28 }
 0x1c8   : > { %v895_v31 = vadd.f32 1e-12, %v891_v30 }
 0x1ca   : > { %3500 = vrsqrt.f32 %v895_v31 }
 0x1cc   : > { %v3495_v32 = vpop.eup %3494 }
 0x1cd   : > { %v900_v34 = vmul.f32 %v3495_v32, %v872_v8 }
 0x1cf   : > { %v910_v36 = vmul.f32 %v3088_v33, %v900_v34 }
 0x1d0   : > { %v3497_v37 = vpop.eup %3496 }
 0x1d1   : > { %v3499_v38 = vpop.eup %3498  ;;  %v920_v39 = vadd.f32 %v3089_v35, %v910_v36  ;;  %v901_v40 = vmul.f32 %v3497_v37, %v873_v15 }
 0x1d2   : > { %v902_v41 = vmul.f32 %v3499_v38, %v874_v9 }
 0x1d3   : > { %924 = vst [vmem:[#allocation2] sm:$0xff] %v920_v39  ;;  %v911_v42 = vmul.f32 %v3088_v33, %v901_v40 }
 0x1d4   : > { %v3501_v43 = vpop.eup %3500  ;;  %v912_v44 = vmul.f32 %v3088_v33, %v902_v41 }
 0x1d5   : > { %v921_v45 = vadd.f32 %v3089_v35, %v911_v42  ;;  %v903_v46 = vmul.f32 %v3501_v43, %v875_v16 }
 0x1d6   : > { %v922_v47 = vadd.f32 %v3089_v35, %v912_v44 }
 0x1d7   : > { %925 = vst [vmem:[#allocation2 + $0x8] sm:$0xff] %v921_v45  ;;  %v913_v48 = vmul.f32 %v3088_v33, %v903_v46 }
 0x1d8   : > { %926 = vst [vmem:[#allocation2 + $0x10] sm:$0xff] %v922_v47 }
 0x1d9   : > { %v923_v49 = vadd.f32 %v3089_v35, %v913_v48 }
 0x1db   : > { %927 = vst [vmem:[#allocation2 + $0x18] sm:$0xff] %v923_v49 }
 0x1dc PF: > { %v3502_v50 = vld [vmem:[%s4156_s18 + $0x4] ss:$24 sps:$4 sm:$0xff]   ;;  %v3504_v51 = vld [vmem:[%s4156_s18] ss:$24 sps:$4 sm:$0xff]   ;;  %v3881_v52 = vmov 0   ;;  %v3882_v41 = vmov 0.0   ;;  %v984_v42 = vlaneseq  ;;  %s4681_s23 = scalar_lea.vmem %s4611_s7, %s4175_s3  ;;  %s4682_s19 = scalar_lea.vmem %s4612_s8, %s4175_s3 }
 0x1dd   : > { %1286 = vmatprep.mubr.bf16.mxu0 %v3881_v52  ;;  %1339 = vmatprep.mubr.bf16.mxu1 %v3881_v52  ;;  %v3505_v53 = vld [vmem:[%s4156_s18 + $0x34] ss:$24 sps:$4 sm:$0xff]   ;;  %v3507_v54 = vld [vmem:[%s4156_s18 + $0x30] ss:$24 sps:$4 sm:$0xff]   ;;  %v3508_v55 = vld [vmem:[%s4156_s18 + $0x64] ss:$24 sps:$4 sm:$0xff]   ;;  %s4683_s29 = scalar_lea.vmem %s4613_s9, %s4175_s3  ;;  %s4684_s28 = scalar_lea.vmem %s4617_s13, %s4175_s3 }
 0x1de   : > { %1254 = vmatprep.subr.bf16.mxu0 %v3502_v50  ;;  %v3510_v56 = vld [vmem:[%s4156_s18 + $0x60] ss:$24 sps:$4 sm:$0xff]   ;;  %v3511_v57 = vld [vmem:[%s4156_s18 + $0x94] ss:$24 sps:$4 sm:$0xff]   ;;  %v3513_v58 = vld [vmem:[%s4156_s18 + $0x90] ss:$24 sps:$4 sm:$0xff]  }
 0x1df   : > { %1255 = vmatpush1.bf16.msra.mxu0 %v3504_v51  ;;  %v3514_v59 = vld [vmem:[%s4156_s18 + $0xc4] ss:$24 sps:$4 sm:$0xff]   ;;  %v3528_v61 = vld [vmem:[%s4156_s18 + $0x8] ss:$24 sps:$4 sm:$0xff]   ;;  %v3531_v0 = vld [vmem:[%s4156_s18 + $0x38] ss:$24 sps:$4 sm:$0xff]  }
 0x1e0   : > { %1256 = vmatprep.subr.bf16.mxu0 %v3505_v53  ;;  %v3526_v60 = vld [vmem:[%s4156_s18 + $0xc] ss:$24 sps:$4 sm:$0xff]   ;;  %v3529_v62 = vld [vmem:[%s4156_s18 + $0x3c] ss:$24 sps:$4 sm:$0xff]   ;;  %v3516_v63 = vld [vmem:[%s4156_s18 + $0xc0] ss:$24 sps:$4 sm:$0xff]  }
 0x1e1   : > { %1307 = vmatprep.subr.bf16.mxu1 %v3526_v60  ;;  %v3517_v1 = vld [vmem:[%s4156_s18 + $0xf4] ss:$24 sps:$4 sm:$0xff]   ;;  %v3519_v3 = vld [vmem:[%s4156_s18 + $0xf0] ss:$24 sps:$4 sm:$0xff]   ;;  %v3520_v5 = vld [vmem:[%s4156_s18 + $0x124] ss:$24 sps:$4 sm:$0xff]  }
 0x1e2   : > { %1308 = vmatpush1.bf16.msra.mxu1 %v3528_v61  ;;  %v3532_v2 = vld [vmem:[%s4156_s18 + $0x6c] ss:$24 sps:$4 sm:$0xff]   ;;  %v3534_v4 = vld [vmem:[%s4156_s18 + $0x68] ss:$24 sps:$4 sm:$0xff]   ;;  %v3535_v6 = vld [vmem:[%s4156_s18 + $0x9c] ss:$24 sps:$4 sm:$0xff]  }
 0x1e3   : > { %1257 = vmatpush1.bf16.msra.mxu0 %v3507_v54  ;;  %1309 = vmatprep.subr.bf16.mxu1 %v3529_v62  ;;  %v3522_v7 = vld [vmem:[%s4156_s18 + $0x120] ss:$24 sps:$4 sm:$0xff]   ;;  %v3523_v9 = vld [vmem:[%s4156_s18 + $0x154] ss:$24 sps:$4 sm:$0xff]   ;;  %v3525_v11 = vld [vmem:[%s4156_s18 + $0x150] ss:$24 sps:$4 sm:$0xff]  }
 0x1e4   : > { %1258 = vmatprep.subr.bf16.mxu0 %v3508_v55  ;;  %v3537_v8 = vld [vmem:[%s4156_s18 + $0x98] ss:$24 sps:$4 sm:$0xff]   ;;  %v3538_v10 = vld [vmem:[%s4156_s18 + $0xcc] ss:$24 sps:$4 sm:$0xff]   ;;  %v3540_v14 = vld [vmem:[%s4156_s18 + $0xc8] ss:$24 sps:$4 sm:$0xff]  }
 0x1e5   : > { %v4271_v12 = vld [vmem:[#allocation2] sm:$0xff]  ;;  %v4273_v13 = vld [vmem:[#allocation2 + $0x8] sm:$0xff]  ;;  %v3541_v15 = vld [vmem:[%s4156_s18 + $0xfc] ss:$24 sps:$4 sm:$0xff]   ;;  %vm3883_vm0 = vmmov 0   ;;  %v4321_v43 = vshrl.u32 %v984_v42, 7 }
 0x1e6   : > { %1310 = vmatpush1.bf16.msra.mxu1 %v3531_v0  ;;  %v4279_v16 = vpack.c.bf16 %v4273_v13, %v4271_v12  ;;  %v3552_v17 = vld [vmem:[%s4156_s18 + $0x14] ss:$24 sps:$4 sm:$0xff]   ;;  %v3543_v18 = vld [vmem:[%s4156_s18 + $0xf8] ss:$24 sps:$4 sm:$0xff]   ;;  %v3546_v21 = vld [vmem:[%s4156_s18 + $0x128] ss:$24 sps:$4 sm:$0xff]  }
 0x1e7   : > { %1259 = vmatpush1.bf16.msra.mxu0 %v3510_v56  ;;  %1311 = vmatprep.subr.bf16.mxu1 %v3532_v2  ;;  %v3544_v19 = vld [vmem:[%s4156_s18 + $0x12c] ss:$24 sps:$4 sm:$0xff]   ;;  %v3550_v20 = vld [vmem:[%s4156_s18 + $0x10] ss:$24 sps:$4 sm:$0xff]   ;;  %v4289_v24 = vld [vmem:[#allocation2 + $0x18] sm:$0xff]  ;;  %v986_v44 = vsub.s32 0, %v4321_v43 }
 0x1e8   : > { %1260 = vmatprep.subr.bf16.mxu0 %v3511_v57  ;;  %v3555_v22 = vld [vmem:[%s4156_s18 + $0x44] ss:$24 sps:$4 sm:$0xff]   ;;  %v4287_v23 = vld [vmem:[#allocation2 + $0x10] sm:$0xff]  ;;  %v3553_v26 = vld [vmem:[%s4156_s18 + $0x40] ss:$24 sps:$4 sm:$0xff]   ;;  %v990_v46 = vsub.s32 1, %v4321_v43 }
 0x1e9   : > { %v3547_v25 = vld [vmem:[%s4156_s18 + $0x15c] ss:$24 sps:$4 sm:$0xff]   ;;  %v3549_v27 = vld [vmem:[%s4156_s18 + $0x158] ss:$24 sps:$4 sm:$0xff]   ;;  %v933_v29 = vpack.c.bf16 %v4289_v24, %v4287_v23  ;;  %v982_v45 = vld [vmem:[%s4191_s0] sm:$0x3f] }
 0x1ea   : > { %1312 = vmatpush1.bf16.msra.mxu1 %v3534_v4  ;;  %v3558_v28 = vld [vmem:[%s4156_s18 + $0x74] ss:$24 sps:$4 sm:$0xff]   ;;  %v3556_v30 = vld [vmem:[%s4156_s18 + $0x70] ss:$24 sps:$4 sm:$0xff]   ;;  %v3561_v31 = vld [vmem:[%s4156_s18 + $0xa4] ss:$24 sps:$4 sm:$0xff]   ;;  %v987_v47 = vrot.slane %v982_v45, %v986_v44  ;;  %v991_v49 = vrot.slane %v982_v45, %v990_v46 }
 0x1eb   : > { %1261 = vmatpush1.bf16.msra.mxu0 %v3513_v58  ;;  %1313 = vmatprep.subr.bf16.mxu1 %v3535_v6  ;;  %v3559_v32 = vld [vmem:[%s4156_s18 + $0xa0] ss:$24 sps:$4 sm:$0xff]   ;;  %v3564_v33 = vld [vmem:[%s4156_s18 + $0xd4] ss:$24 sps:$4 sm:$0xff]   ;;  %v3562_v34 = vld [vmem:[%s4156_s18 + $0xd0] ss:$24 sps:$4 sm:$0xff]  }
 0x1ec   : > { %1262 = vmatprep.subr.bf16.mxu0 %v3514_v59  ;;  %v3567_v35 = vld [vmem:[%s4156_s18 + $0x104] ss:$24 sps:$4 sm:$0xff]   ;;  %v3565_v36 = vld [vmem:[%s4156_s18 + $0x100] ss:$24 sps:$4 sm:$0xff]   ;;  %v3570_v37 = vld [vmem:[%s4156_s18 + $0x134] ss:$24 sps:$4 sm:$0xff]  }
 0x1ed   : > { %v3568_v38 = vld [vmem:[%s4156_s18 + $0x130] ss:$24 sps:$4 sm:$0xff]   ;;  %v3573_v39 = vld [vmem:[%s4156_s18 + $0x164] ss:$24 sps:$4 sm:$0xff]   ;;  %v3571_v40 = vld [vmem:[%s4156_s18 + $0x160] ss:$24 sps:$4 sm:$0xff]  }
 0x1ee   : > { %1314 = vmatpush1.bf16.msra.mxu1 %v3537_v8  ;;  %v994_v59 = vsub.s32 2, %v4321_v43  ;;  %v998_v61 = vsub.s32 3, %v4321_v43  ;;  %s4679_s1 = sld [smem:[#allocation19_spill]]  ;;  %vm1464_vm1 = vcmask 130048   ;;  %p3199_p8 = scmp.ne.s32.totalorder %s4011_s2, 1 }
 0x1ef   : > { %1263 = vmatpush1.bf16.msra.mxu0 %v3516_v63  ;;  %1315 = vmatprep.subr.bf16.mxu1 %v3538_v10  ;;  %vm3885_vm2 = vmmov (!%p3199_p8), 0   ;;  %vm2652_vm3 = vcmask (!%p3199_p8), 1040384   ;;  %s4688_s27 = sld [smem:[#allocation29_spill]] (!%p3199_p8) }
 0x1f0   : > { %1264 = vmatprep.subr.bf16.mxu0 %v3517_v1  ;;  %v995_v63 = vrot.slane %v982_v45, %v994_v59  ;;  %v999_v2 = vrot.slane %v982_v45, %v998_v61 }
 0x1f2   : > { %1316 = vmatpush1.bf16.msra.mxu1 %v3540_v14 }
 0x1f3   : > { %1265 = vmatpush1.bf16.msra.mxu0 %v3519_v3  ;;  %1317 = vmatprep.subr.bf16.mxu1 %v3541_v15 }
 0x1f4   : > { %1266 = vmatprep.subr.bf16.mxu0 %v3520_v5  ;;  %s4680_s30 = smov %s4679_s1 }
 0x1f6   : > { %1318 = vmatpush1.bf16.msra.mxu1 %v3543_v18 }
 0x1f7   : > { %1267 = vmatpush1.bf16.msra.mxu0 %v3522_v7  ;;  %1319 = vmatprep.subr.bf16.mxu1 %v3544_v19 }
 0x1f8   : > { %1268 = vmatprep.subr.bf16.mxu0 %v3523_v9 }
 0x1fa   : > { %1320 = vmatpush1.bf16.msra.mxu1 %v3546_v21 }
 0x1fb   : > { %1269 = vmatpush1.bf16.msra.mxu0 %v3525_v11  ;;  %1321 = vmatprep.subr.bf16.mxu1 %v3547_v25 }
 0x1fc   : > { %1360 = vmatprep.subr.bf16.mxu0 %v3552_v17 }
 0x1fe   : > { %1287 = vmatmul.mubr.bf16.vlgmr.msra.gmra.mrb[0].mxu0 %v4279_v16  ;;  %1322 = vmatpush1.bf16.msra.mxu1 %v3549_v27 }
 0x1ff   : > { %1296 = vmatprep.mubr.bf16.mxu0 %v3881_v52  ;;  %1361 = vmatpush1.bf16.msra.mxu0 %v3550_v20 }
 0x200   : > { %1362 = vmatprep.subr.bf16.mxu0 %v3555_v22  ;;  %3403 = vmatprep.subr.bf16.mxu1 %v3552_v17 }
 0x201   : > { %1340 = vmatmul.mubr.bf16.vlgmr.msra.gmra.mrb[0].mxu1 %v4279_v16 }
 0x202   : > { %3411 = vmatpush1.bf16.msra.mxu1 %v3550_v20  ;;  %1349 = vmatprep.mubr.bf16.mxu1 %v3881_v52 }
 0x203   : > { %1363 = vmatpush1.bf16.msra.mxu0 %v3553_v26  ;;  %3404 = vmatprep.subr.bf16.mxu1 %v3555_v22 }
 0x204   : > { %1364 = vmatprep.subr.bf16.mxu0 %v3558_v28 }
 0x206   : > { %1297 = vmatmul.mubr.bf16.gmra.mrb[4].mxu0 %v933_v29  ;;  %3412 = vmatpush1.bf16.msra.mxu1 %v3553_v26 }
 0x207   : > { %1392 = vmatprep.mubr.bf16.mxu0 %v3881_v52  ;;  %1365 = vmatpush1.bf16.msra.mxu0 %v3556_v30 }
 0x208   : > { %1366 = vmatprep.subr.bf16.mxu0 %v3561_v31  ;;  %3405 = vmatprep.subr.bf16.mxu1 %v3558_v28 }
 0x209   : > { %1350 = vmatmul.mubr.bf16.gmra.mrb[4].mxu1 %v933_v29 }
 0x20a   : > { %3413 = vmatpush1.bf16.msra.mxu1 %v3556_v30  ;;  %1402 = vmatprep.mubr.bf16.mxu1 %v3881_v52 }
 0x20b   : > { %1367 = vmatpush1.bf16.msra.mxu0 %v3559_v32  ;;  %3406 = vmatprep.subr.bf16.mxu1 %v3561_v31 }
 0x20c   : > { %1368 = vmatprep.subr.bf16.mxu0 %v3564_v33 }
 0x20e   : > { %3414 = vmatpush1.bf16.msra.mxu1 %v3559_v32 }
 0x20f   : > { %1369 = vmatpush1.bf16.msra.mxu0 %v3562_v34  ;;  %3407 = vmatprep.subr.bf16.mxu1 %v3564_v33 }
 0x210   : > { %1370 = vmatprep.subr.bf16.mxu0 %v3567_v35 }
 0x212   : > { %3415 = vmatpush1.bf16.msra.mxu1 %v3562_v34  ;;  %v1002_v34 = vsub.s32 4, %v4321_v43 }
 0x213   : > { %1371 = vmatpush1.bf16.msra.mxu0 %v3565_v36  ;;  %3408 = vmatprep.subr.bf16.mxu1 %v3567_v35  ;;  %v1006_v35 = vsub.s32 5, %v4321_v43 }
 0x214   : > { %1372 = vmatprep.subr.bf16.mxu0 %v3570_v37 }
 0x216   : > { %3416 = vmatpush1.bf16.msra.mxu1 %v3565_v36  ;;  %v1003_v36 = vrot.slane %v982_v45, %v1002_v34 }
 0x217   : > { %1373 = vmatpush1.bf16.msra.mxu0 %v3568_v38  ;;  %3409 = vmatprep.subr.bf16.mxu1 %v3570_v37  ;;  %v1007_v37 = vrot.slane %v982_v45, %v1006_v35  ;;  %v4362_v45 = vld [vmem:[%s4679_s1] ss:$0 sm:$0xff] }
 0x218   : > { %1374 = vmatprep.subr.bf16.mxu0 %v3573_v39 }
 0x21a   : > { %3417 = vmatpush1.bf16.msra.mxu1 %v3568_v38 }
 0x21b   : > { %1375 = vmatpush1.bf16.msra.mxu0 %v3571_v40  ;;  %3410 = vmatprep.subr.bf16.mxu1 %v3573_v39 }
 0x21c   : > { %3339 = vmatprep.subr.bf16.mxu0 %v3882_v41 }
 0x21e   : > { %1393 = vmatmul.mubr.bf16.vlgmr.msra.gmra.mrb[8].mxu0 %v4279_v16  ;;  %3418 = vmatpush1.bf16.msra.mxu1 %v3571_v40 }
 0x21f   : > { %3315 = vmatprep.subr.bf16.mxu1 %v3882_v41  ;;  %3341 = vmatprep.mubr.msk.bf16.mxu0 %vm3883_vm0, %v3882_v41 }
 0x221   : > { %1403 = vmatmul.mubr.bf16.vlgmr.msra.gmra.mrb[8].mxu1 %v933_v29 }
 0x222   : > { %3317 = vmatprep.mubr.msk.bf16.mxu1 %vm3883_vm0, %v3882_v41 }
 0x2d1   : > { %v1288_v48 = vpop.f32.mrb[0].mxu0 }
 0x2d2   : > { %v1290_v50 = vpop.f32.mrb[1].mxu0  ;;  %v1289_v53 = vadd.f32 %v1288_v48, %v987_v47 }
 0x2d3   : > { %v1292_v51 = vpop.f32.mrb[2].mxu0  ;;  %v1291_v56 = vadd.f32 %v1290_v50, %v991_v49 }
 0x2d4   : > { %v1293_v54 = vadd.f32 %v1292_v51, %v987_v47  ;;  %v1294_v55 = vpop.f32.mrb[3].mxu0  ;;  %v1341_v7 = vpop.f32.mrb[0].mxu1 }
 0x2d5   : > { %v1295_v57 = vadd.f32 %v1294_v55, %v991_v49  ;;  %v1342_v9 = vadd.f32 %v1341_v7, %v995_v63  ;;  %v1343_v10 = vpop.f32.mrb[1].mxu1 }
 0x2d6   : > { %v1414_v58 = vpack.c.bf16 %v1293_v54, %v1289_v53  ;;  %v4333_v14 = vadd.f32 %v1343_v10, %v999_v2  ;;  %v1345_v15 = vpop.f32.mrb[2].mxu1 }
 0x2d7   : > { %v1415_v60 = vpack.c.bf16 %v1295_v57, %v1291_v56  ;;  %v1346_v17 = vadd.f32 %v1345_v15, %v995_v63  ;;  %v1347_v18 = vpop.f32.mrb[3].mxu1 }
 0x2d8   : > { %v4335_v19 = vadd.f32 %v1347_v18, %v999_v2 }
 0x2d9   : > { %3316 = vmatpush3.bf16.xpose.msra.mxu1 %v1415_v60  ;;  %v1298_v62 = vpop.f32.mrb[4].mxu0  ;;  %v1416_v20 = vpack.c.bf16 %v1346_v17, %v1342_v9 }
 0x2da   : > { %3321 = vmatprep.subr.bf16.mxu1 %v3882_v41  ;;  %v1299_v0 = vadd.f32 %v1298_v62, %v987_v47  ;;  %v1300_v1 = vpop.f32.mrb[5].mxu0  ;;  %v1534_v21 = vpack.c.bf16 %v4335_v19, %v4333_v14  ;;  %v3142_v19 = vld [vmem:[%s4680_s30 + $0x1] ss:$0 sm:$0xff] }
 0x2db   : > { %v1301_v3 = vadd.f32 %v1300_v1, %v991_v49  ;;  %v1302_v4 = vpop.f32.mrb[6].mxu0 }
 0x2dc   : > { %v1303_v5 = vadd.f32 %v1302_v4, %v987_v47  ;;  %v1304_v6 = vpop.f32.mrb[7].mxu0  ;;  %v1351_v22 = vpop.f32.mrb[4].mxu1 }
 0x2dd   : > { %v1305_v8 = vadd.f32 %v1304_v6, %v991_v49  ;;  %v4343_v25 = vadd.f32 %v1351_v22, %v995_v63  ;;  %v1353_v26 = vpop.f32.mrb[5].mxu1 }
 0x2de   : > { %v1649_v11 = vpack.c.bf16 %v1303_v5, %v1299_v0  ;;  %v1354_v27 = vadd.f32 %v1353_v26, %v999_v2  ;;  %v1355_v28 = vpop.f32.mrb[6].mxu1 }
 0x2df   : > { %v1650_v16 = vpack.c.bf16 %v1305_v8, %v1301_v3  ;;  %v4345_v29 = vadd.f32 %v1355_v28, %v995_v63  ;;  %v1357_v30 = vpop.f32.mrb[7].mxu1 }
 0x2e0   : > { %3318 = vmatmul.mubr.bf16.vlgmr.msra.gmra.mrb[12].mxu1 %v1414_v58  ;;  %v1358_v31 = vadd.f32 %v1357_v30, %v999_v2 }
 0x2e1   : > { %3340 = vmatpush3.bf16.xpose.msra.mxu0 %v1650_v16  ;;  %3323 = vmatprep.mubr.msk.bf16.mxu1 %vm3883_vm0, %v3882_v41  ;;  %v1651_v32 = vpack.c.bf16 %v4345_v29, %v4343_v25 }
 0x2e2   : > { %3351 = vmatprep.subr.bf16.mxu0 %v3882_v41  ;;  %3322 = vmatpush3.bf16.msra.mxu1 %v1416_v20  ;;  %v1768_v33 = vpack.c.bf16 %v1358_v31, %v1354_v27 }
 0x2e3   : > { %3327 = vmatprep.subr.bf16.mxu1 %v3882_v41 }
 0x2e8   : > { %3342 = vmatmul.mubr.bf16.vlgmr.msra.gmra.mrb[12].mxu0 %v1649_v11 }
 0x2e9   : > { %3353 = vmatprep.mubr.msk.bf16.mxu0 %vm3883_vm0, %v3882_v41 }
 0x2f1   : > { %v1394_v62 = vpop.f32.mrb[8].mxu0 }
 0x2f2   : > { %v1395_v63 = vadd.f32 %v1394_v62, %v1003_v36  ;;  %v1396_v0 = vpop.f32.mrb[9].mxu0 }
 0x2f3   : > { %v1397_v1 = vadd.f32 %v1396_v0, %v1007_v37  ;;  %v1398_v2 = vpop.f32.mrb[10].mxu0 }
 0x2f4   : > { %v1404_v38 = vpop.f32.mrb[8].mxu1  ;;  %v1399_v3 = vadd.f32 %v1398_v2, %v1003_v36  ;;  %v1400_v4 = vpop.f32.mrb[11].mxu0 }
 0x2f5   : > { %v1405_v39 = vadd.f32 %v1404_v38, %v1003_v36  ;;  %v1406_v40 = vpop.f32.mrb[9].mxu1  ;;  %v1401_v5 = vadd.f32 %v1400_v4, %v1007_v37 }
 0x2f6   : > { %v4353_v42 = vadd.f32 %v1406_v40, %v1007_v37  ;;  %v1408_v47 = vpop.f32.mrb[10].mxu1  ;;  %v1535_v7 = vpack.c.bf16 %v1399_v3, %v1395_v63 }
 0x2f7   : > { %v1409_v48 = vadd.f32 %v1408_v47, %v1003_v36  ;;  %v1410_v49 = vpop.f32.mrb[11].mxu1  ;;  %v1536_v9 = vpack.c.bf16 %v1401_v5, %v1397_v1 }
 0x2f8   : > { %v4355_v50 = vadd.f32 %v1410_v49, %v1007_v37 }
 0x2f9   : > { %v1769_v51 = vpack.c.bf16 %v1409_v48, %v1405_v39 }
 0x2fa   : > { %v1770_v53 = vpack.c.bf16 %v4355_v50, %v4353_v42 }
 0x2fb   : > { %3352 = vmatpush3.bf16.xpose.msra.mxu0 %v1769_v51 }
 0x302   : > { %3354 = vmatmul.mubr.bf16.vlgmr.msra.gmra.mrb[16].mxu0 %v1768_v33 }
 0x3b3   : > { %v1457_v54 = vpop.f32.mrb[12].mxu1 }
 0x3b4   : > { %v1458_v55 = vadd.f32 %v4362_v45, %v1457_v54  ;;  %v3319_v56 = vpop.f32.mrb[13].mxu1 }
 0x3b5   : > { %v1460_v57 = vpop.f32.mrb[14].mxu1 }
 0x3b6   : > { %v1461_v58 = vadd.f32 %v4362_v45, %v1460_v57  ;;  %v3320_v59 = vpop.f32.mrb[15].mxu1  ;;  %v1465_v60 = vsel %vm1464_vm1, %v1458_v55, -inf }
 0x3b7   : > { %1466 = vmax.xlane.f32.xlu0 %v1465_v60 }
 0x3b8   : > { %v1468_v61 = vsel %vm1464_vm1, %v1461_v58, -inf }
 0x3bb   : > { %1469 = vmax.xlane.f32.xlu0 %v1468_v61  ;;  %v1692_v6 = vpop.f32.mrb[12].mxu0 }
 0x3bc   : > { %v3343_v8 = vpop.f32.mrb[13].mxu0  ;;  %v1693_v59 = vadd.f32 %v3142_v19, %v1692_v6 }
 0x3bd   : > { %v1695_v10 = vpop.f32.mrb[14].mxu0 }
 0x3be   : > { %v3344_v11 = vpop.f32.mrb[15].mxu0  ;;  %v1696_v63 = vadd.f32 %v3142_v19, %v1695_v10  ;;  %v1699_v2 = vsel %vm1464_vm1, %v1693_v59, -inf }
 0x3c0   : > { %v1702_v4 = vsel %vm1464_vm1, %v1696_v63, -inf }
 0x3d5   : > { %v1805_v15 = vpop.f32.mrb[16].mxu0 }
 0x3d6   : > { %v3355_v16 = vpop.f32.mrb[17].mxu0  ;;  %v1806_v1 = vadd.f32 %v3142_v19, %v1805_v15 }
 0x3d7   : > { %v1808_v17 = vpop.f32.mrb[18].mxu0 }
 0x3d8   : > { %v3356_v18 = vpop.f32.mrb[19].mxu0  ;;  %v1809_v3 = vadd.f32 %v3142_v19, %v1808_v17  ;;  %v1812_v5 = vsel %vm1464_vm1, %v1806_v1, -inf  ;;  %v3576_v19 = vld [vmem:[%s4182_s4 + $0x48] sm:$0xff]  }
 0x444   : > { %v1467_v20 = vpop.xlane.xlu0 %1466 }
 0x445   : > { %v1471_v22 = vsub.f32 %v1458_v55, %v1467_v20 }
 0x447   : > { %v1473_v26 = vmul.f32 1.442695, %v1471_v22 }
 0x448   : > { %v1470_v27 = vpop.xlane.xlu0 %1469 }
 0x449   : > { %3630 = vpow2.f32 %v1473_v26  ;;  %v1472_v28 = vsub.f32 %v1461_v58, %v1470_v27 }
 0x44b   : > { %v1475_v30 = vmul.f32 1.442695, %v1472_v28 }
 0x44d   : > { %3632 = vpow2.f32 %v1475_v30 }
 0x453   : > { %v3631_v31 = vpop.eup %3630 }
 0x454   : > { %v1477_v33 = vsel %vm1464_vm1, %v3631_v31, 0.0 }
 0x455   : > { %1478 = vadd.xlane.f32.xlu1 %v1477_v33 }
 0x457   : > { %v3633_v34 = vpop.eup %3632 }
 0x458   : > { %v1480_v35 = vsel %vm1464_vm1, %v3633_v34, 0.0 }
 0x459   : > { %1481 = vadd.xlane.f32.xlu1 %v1480_v35 }
 0x4e2   : > { %v1479_v36 = vpop.xlane.xlu1 %1478 }
 0x4e3   : > { %3634 = vrcp.f32 %v1479_v36 }
 0x4e6   : > { %v1482_v37 = vpop.xlane.xlu1 %1481 }
 0x4e7   : > { %3636 = vrcp.f32 %v1482_v37 }
 0x4ed   : > { %v3635_v38 = vpop.eup %3634 }
 0x4ee   : > { %v1485_v40 = vmul.f32 %v3635_v38, %v3631_v31 }
 0x4f1   : > { %v3637_v39 = vpop.eup %3636 }
 0x4f2   : > { %v1486_v47 = vmul.f32 %v3637_v39, %v3633_v34 }
 0x4f4   : > { %v1487_v48 = vpack.c.bf16 %v1486_v47, %v1485_v40 }
 0x4f6   : > { %3324 = vmatmul.mubr.msk.bf16.vlgmr.msra.gmra.mrb[16].mxu1 %vm1464_vm1, %v1487_v48 }
 0x4f7   : > { %3328 = vmatpush3.bf16.xpose.msra.mxu1 %v1535_v7  ;;  %3329 = vmatprep.mubr.msk.bf16.mxu1 %vm3883_vm0, %v3882_v41 }
 0x4f8   : > { %3333 = vmatprep.subr.bf16.mxu1 %v3882_v41 }
 0x4fe   : > { %3330 = vmatmul.mubr.bf16.vlgmr.msra.gmra.mrb[20].mxu1 %v1534_v21 }
 0x4ff   : > { %3334 = vmatpush3.bf16.msra.mxu1 %v1536_v9  ;;  %3335 = vmatprep.mubr.msk.bf16.mxu1 %vm3883_vm0, %v3882_v41 }
 0x500   : > { %3345 = vmatprep.subr.bf16.mxu1 %v3882_v41 }
 0x5c9   : > { %v4380_v49 = vpop.f32.mrb[16].mxu1 }
 0x5ca   : > { %v3325_v51 = vpop.f32.mrb[17].mxu1 }
 0x5cb   : > { %v4382_v54 = vpop.f32.mrb[18].mxu1 }
 0x5cc   : > { %v1889_v55 = vpack.c.bf16 %v4382_v54, %v4380_v49  ;;  %v3326_v56 = vpop.f32.mrb[19].mxu1 }
 0x5d1   : > { %v1571_v57 = vpop.f32.mrb[20].mxu1 }
 0x5d2   : > { %v1572_v58 = vadd.f32 %v4362_v45, %v1571_v57  ;;  %v3331_v14 = vpop.f32.mrb[21].mxu1 }
 0x5d3   : > { %v1574_v21 = vpop.f32.mrb[22].mxu1  ;;  %v3575_v14 = vld [vmem:[%s4182_s4] sm:$0xff]  }
 0x5d4   : > { %v1575_v60 = vadd.f32 %v4362_v45, %v1574_v21  ;;  %v3332_v61 = vpop.f32.mrb[23].mxu1  ;;  %v1578_v62 = vsel %vm1464_vm1, %v1572_v58, -inf  ;;  %v1815_v45 = vsel %vm1464_vm1, %v1809_v3, -inf  ;;  %v3577_v21 = vld [vmem:[%s4182_s4 + $0x8] sm:$0xff]  }
 0x5d5   : > { %1579 = vmax.xlane.f32.xlu0 %v1578_v62  ;;  %v3580_v61 = vld [vmem:[%s4182_s4 + $0x58] sm:$0xff]  }
 0x5d6   : > { %v1581_v0 = vsel %vm1464_vm1, %v1575_v60, -inf  ;;  %v3581_v62 = vld [vmem:[%s4182_s4 + $0x18] sm:$0xff]  }
 0x5d7   : > { %1582 = vmax.xlane.f32.xlu1 %v1581_v0  ;;  %v3583_v0 = vld [vmem:[%s4182_s4 + $0x20] sm:$0xff]  }
 0x5d9   : > { %1700 = vmax.xlane.f32.xlu0 %v1699_v2  ;;  %v3585_v2 = vld [vmem:[%s4182_s4 + $0x28] sm:$0xff]  }
 0x5db   : > { %1703 = vmax.xlane.f32.xlu1 %v1702_v4  ;;  %v3587_v4 = vld [vmem:[%s4182_s4 + $0x30] sm:$0xff]  }
 0x5dd   : > { %1813 = vmax.xlane.f32.xlu0 %v1812_v5 }
 0x5df   : > { %1816 = vmax.xlane.f32.xlu1 %v1815_v45 }
 0x662   : > { %v1580_v6 = vpop.xlane.xlu0 %1579 }
 0x663   : > { %v1584_v7 = vsub.f32 %v1572_v58, %v1580_v6  ;;  %v3574_v58 = vld [vmem:[%s4182_s4 + $0x40] sm:$0xff]  }
 0x664   : > { %v1583_v8 = vpop.xlane.xlu1 %1582  ;;  %3241 = vmatprep.subr.bf16.mxu0 %v3574_v58  ;;  %v3145_v58 = vld [vmem:[%s4681_s23] ss:$0 sm:$0xff] }
 0x665   : > { %v1586_v9 = vmul.f32 1.442695, %v1584_v7  ;;  %v1585_v10 = vsub.f32 %v1575_v60, %v1583_v8  ;;  %3242 = vmatpush3.bf16.msra.mxu0 %v3575_v14  ;;  %v3579_v60 = vld [vmem:[%s4182_s4 + $0x10] sm:$0xff]  }
 0x666   : > { %v1701_v11 = vpop.xlane.xlu0 %1700  ;;  %3243 = vmatprep.subr.bf16.mxu0 %v3576_v19 }
 0x667   : > { %3638 = vpow2.f32 %v1586_v9  ;;  %v1588_v15 = vmul.f32 1.442695, %v1585_v10  ;;  %v1705_v16 = vsub.f32 %v1693_v59, %v1701_v11  ;;  %v3578_v59 = vld [vmem:[%s4182_s4 + $0x50] sm:$0xff]  }
 0x668   : > { %v1704_v18 = vpop.xlane.xlu1 %1703 }
 0x669   : > { %3640 = vpow2.f32 %v1588_v15  ;;  %v1707_v17 = vmul.f32 1.442695, %v1705_v16  ;;  %v1706_v20 = vsub.f32 %v1696_v63, %v1704_v18  ;;  %3244 = vmatpush3.bf16.msra.mxu0 %v3577_v21  ;;  %v3582_v63 = vld [vmem:[%s4182_s4 + $0x60] sm:$0xff]  }
 0x66a   : > { %v1814_v22 = vpop.xlane.xlu0 %1813  ;;  %3245 = vmatprep.subr.bf16.mxu0 %v3578_v59 }
 0x66b   : > { %3642 = vpow2.f32 %v1707_v17  ;;  %v1709_v26 = vmul.f32 1.442695, %v1706_v20  ;;  %v1818_v27 = vsub.f32 %v1806_v1, %v1814_v22  ;;  %v3584_v1 = vld [vmem:[%s4182_s4 + $0x68] sm:$0xff]  }
 0x66c   : > { %v1817_v28 = vpop.xlane.xlu1 %1816 }
 0x66d   : > { %3644 = vpow2.f32 %v1709_v26  ;;  %v1820_v30 = vmul.f32 1.442695, %v1818_v27  ;;  %v1819_v31 = vsub.f32 %v1809_v3, %v1817_v28  ;;  %3246 = vmatpush3.bf16.msra.mxu0 %v3579_v60  ;;  %v3586_v3 = vld [vmem:[%s4182_s4 + $0x70] sm:$0xff]  }
 0x66e   : > { %3247 = vmatprep.subr.bf16.mxu0 %v3580_v61 }
 0x66f   : > { %3646 = vpow2.f32 %v1820_v30  ;;  %v1822_v33 = vmul.f32 1.442695, %v1819_v31  ;;  %v3588_v31 = vld [vmem:[%s4182_s4 + $0x78] sm:$0xff]  }
 0x671   : > { %v3639_v34 = vpop.eup %3638  ;;  %3648 = vpow2.f32 %v1822_v33  ;;  %3248 = vmatpush3.bf16.msra.mxu0 %v3581_v62  ;;  %v3589_v33 = vld [vmem:[%s4182_s4 + $0x38] sm:$0xff]  }
 0x672   : > { %v1590_v35 = vsel %vm1464_vm1, %v3639_v34, 0.0  ;;  %3249 = vmatprep.subr.bf16.mxu0 %v3582_v63 }
 0x673   : > { %v3641_v36 = vpop.eup %3640  ;;  %1591 = vadd.xlane.f32.xlu0 %v1590_v35 }
 0x674   : > { %v1593_v37 = vsel %vm1464_vm1, %v3641_v36, 0.0 }
 0x675   : > { %v4399_v38 = vpop.eup %3642  ;;  %1594 = vadd.xlane.f32.xlu1 %v1593_v37  ;;  %3250 = vmatpush3.bf16.msra.mxu0 %v3583_v0 }
 0x676   : > { %v1711_v39 = vsel %vm1464_vm1, %v4399_v38, 0.0  ;;  %3251 = vmatprep.subr.bf16.mxu0 %v3584_v1 }
 0x677   : > { %v3645_v40 = vpop.eup %3644  ;;  %1712 = vadd.xlane.f32.xlu0 %v1711_v39 }
 0x678   : > { %v1714_v47 = vsel %vm1464_vm1, %v3645_v40, 0.0 }
 0x679   : > { %v4404_v48 = vpop.eup %3646  ;;  %1715 = vadd.xlane.f32.xlu1 %v1714_v47  ;;  %3252 = vmatpush3.bf16.msra.mxu0 %v3585_v2 }
 0x67a   : > { %v1824_v51 = vsel %vm1464_vm1, %v4404_v48, 0.0  ;;  %3253 = vmatprep.subr.bf16.mxu0 %v3586_v3 }
 0x67b   : > { %v4408_v56 = vpop.eup %3648  ;;  %1825 = vadd.xlane.f32.xlu0 %v1824_v51 }
 0x67c   : > { %v1827_v57 = vsel %vm1464_vm1, %v4408_v56, 0.0 }
 0x67d   : > { %1828 = vadd.xlane.f32.xlu1 %v1827_v57  ;;  %3254 = vmatpush3.bf16.msra.mxu0 %v3587_v4 }
 0x67e   : > { %3255 = vmatprep.subr.bf16.mxu0 %v3588_v31  ;;  %v3601_v31 = vld [vmem:[%s4204_s6 + $0x34] ss:$8 sps:$4 sm:$0xff]  }
 0x681   : > { %3256 = vmatpush3.bf16.msra.mxu0 %v3589_v33  ;;  %v3599_v33 = vld [vmem:[%s4204_s6 + $0x30] ss:$8 sps:$4 sm:$0xff]  }
 0x700   : > { %v1592_v5 = vpop.xlane.xlu0 %1591 }
 0x701   : > { %3650 = vrcp.f32 %v1592_v5 }
 0x702   : > { %v1595_v45 = vpop.xlane.xlu1 %1594 }
 0x703   : > { %3652 = vrcp.f32 %v1595_v45 }
 0x704   : > { %v1713_v6 = vpop.xlane.xlu0 %1712 }
 0x706   : > { %v1716_v7 = vpop.xlane.xlu1 %1715 }
 0x707   : > { %3654 = vrcp.f32 %v1716_v7  ;;  %v3592_v7 = vld [vmem:[%s4204_s6 + $0x4] ss:$8 sps:$4 sm:$0xff]  }
 0x708   : > { %3656 = vrcp.f32 %v1713_v6  ;;  %v1826_v16 = vpop.xlane.xlu0 %1825  ;;  %v3590_v6 = vld [vmem:[%s4204_s6] ss:$8 sps:$4 sm:$0xff]  }
 0x70a   : > { %v1829_v9 = vpop.xlane.xlu1 %1828 }
 0x70b   : > { %v3651_v8 = vpop.eup %3650  ;;  %3658 = vrcp.f32 %v1829_v9 }
 0x70c   : > { %v1598_v11 = vmul.f32 %v3651_v8, %v3639_v34  ;;  %3660 = vrcp.f32 %v1826_v16  ;;  %v3593_v8 = vld [vmem:[%s4204_s6 + $0x10] ss:$8 sps:$4 sm:$0xff]  }
 0x70d   : > { %v3653_v10 = vpop.eup %3652 }
 0x70e   : > { %v1599_v15 = vmul.f32 %v3653_v10, %v3641_v36 }
 0x710   : > { %v1600_v18 = vpack.c.bf16 %v1599_v15, %v1598_v11 }
 0x711   : > { %v3655_v17 = vpop.eup %3654 }
 0x712   : > { %3336 = vmatmul.mubr.msk.bf16.vlgmr.msra.gmra.mrb[24].mxu1 %vm1464_vm1, %v1600_v18  ;;  %v3657_v20 = vpop.eup %3656  ;;  %v1720_v22 = vmul.f32 %v3655_v17, %v3645_v40 }
 0x713   : > { %3346 = vmatpush3.bf16.msra.mxu1 %v1651_v32  ;;  %3347 = vmatprep.mubr.msk.bf16.mxu1 %vm3883_vm0, %v3882_v41  ;;  %v1719_v26 = vmul.f32 %v3657_v20, %v4399_v38 }
 0x714   : > { %3357 = vmatprep.subr.bf16.mxu1 %v3882_v41 }
 0x715   : > { %v1721_v27 = vpack.c.bf16 %v1720_v22, %v1719_v26  ;;  %v3659_v28 = vpop.eup %3658 }
 0x716   : > { %v3661_v30 = vpop.eup %3660  ;;  %v1833_v25 = vmul.f32 %v3659_v28, %v4408_v56 }
 0x717   : > { %v1832_v29 = vmul.f32 %v3661_v30, %v4404_v48 }
 0x719   : > { %v1834_v32 = vpack.c.bf16 %v1833_v25, %v1832_v29  ;;  %v3598_v25 = vld [vmem:[%s4204_s6 + $0x24] ss:$8 sps:$4 sm:$0xff]   ;;  %v3596_v29 = vld [vmem:[%s4204_s6 + $0x20] ss:$8 sps:$4 sm:$0xff]  }
 0x71a   : > { %3348 = vmatmul.mubr.msk.bf16.vlgmr.msra.gmra.mrb[28].mxu1 %vm1464_vm1, %v1721_v27 }
 0x71b   : > { %3358 = vmatpush3.bf16.msra.mxu1 %v1770_v53  ;;  %3359 = vmatprep.mubr.msk.bf16.mxu1 %vm3883_vm0, %v3882_v41 }
 0x71c   : > { %2258 = vmatprep.subr.bf16.mxu1 %v3592_v7 }
 0x722   : > { %3360 = vmatmul.mubr.msk.bf16.vlgmr.msra.gmra.mrb[32].mxu1 %vm1464_vm1, %v1834_v32 }
 0x723   : > { %2290 = vmatprep.mubr.bf16.mxu1 %v3881_v52  ;;  %2259 = vmatpush1.bf16.msra.mxu1 %v3590_v6 }
 0x7e5   : > { %v1638_v34 = vpop.f32.mrb[24].mxu1 }
 0x7e6   : > { %v3337_v35 = vpop.f32.mrb[25].mxu1 }
 0x7e7   : > { %v1641_v42 = vpop.f32.mrb[26].mxu1  ;;  %v3602_v35 = vld [vmem:[%s4204_s6 + $0x40] ss:$8 sps:$4 sm:$0xff]  }
 0x7e8   : > { %v1890_v50 = vpack.c.bf16 %v1641_v42, %v1638_v34  ;;  %v3338_v53 = vpop.f32.mrb[27].mxu1  ;;  %v3604_v34 = vld [vmem:[%s4204_s6 + $0x44] ss:$8 sps:$4 sm:$0xff]   ;;  %v3607_v42 = vld [vmem:[%s4204_s6 + $0x54] ss:$8 sps:$4 sm:$0xff]  }
 0x7e9   : > { %v3610_v53 = vld [vmem:[%s4204_s6 + $0x64] ss:$8 sps:$4 sm:$0xff]  }
 0x7ea   : > { %2060 = vmatprep.mubr.bf16.mxu0 %v1890_v50  ;;  %v3605_v50 = vld [vmem:[%s4204_s6 + $0x50] ss:$8 sps:$4 sm:$0xff]  }
 0x7eb   : > { %2061 = vmatmul.mubr.bf16.vlgmr.msra.gmra.mrb[20].mxu0 %v1889_v55 }
 0x7ed   : > { %v1759_v41 = vpop.f32.mrb[28].mxu1 }
 0x7ee   : > { %v3349_v36 = vpop.f32.mrb[29].mxu1 }
 0x7ef   : > { %v1762_v37 = vpop.f32.mrb[30].mxu1  ;;  %v3613_v36 = vld [vmem:[%s4204_s6 + $0x74] ss:$8 sps:$4 sm:$0xff]  }
 0x7f0   : > { %v1891_v38 = vpack.c.bf16 %v1762_v37, %v1759_v41  ;;  %v3350_v39 = vpop.f32.mrb[31].mxu1  ;;  %v3608_v41 = vld [vmem:[%s4204_s6 + $0x60] ss:$8 sps:$4 sm:$0xff]   ;;  %v3611_v37 = vld [vmem:[%s4204_s6 + $0x70] ss:$8 sps:$4 sm:$0xff]  }
 0x7f5   : > { %v1872_v40 = vpop.f32.mrb[32].mxu1 }
 0x7f6   : > { %v3361_v47 = vpop.f32.mrb[33].mxu1 }
 0x7f7   : > { %v1875_v48 = vpop.f32.mrb[34].mxu1 }
 0x7f8   : > { %v1892_v51 = vpack.c.bf16 %v1875_v48, %v1872_v40  ;;  %v3362_v56 = vpop.f32.mrb[35].mxu1 }
 0x7fa   : > { %2068 = vmatprep.mubr.bf16.mxu0 %v1892_v51 }
 0x7fb   : > { %2069 = vmatmul.mubr.bf16.gmra.mrb[24].mxu0 %v1891_v38 }
 0x8be   : > { %v3257_v57 = vpop.f32.mrb[20].mxu0 }
 0x8bf   : > { %v3258_v49 = vpop.f32.mrb[21].mxu0 }
 0x8c0   : > { %v3259_v54 = vadd.f32 %v3258_v49, %v3257_v57  ;;  %v3260_v55 = vpop.f32.mrb[22].mxu0  ;;  %v3162_v57 = vld [vmem:[%s4682_s19] ss:$0 sm:$0xff] }
 0x8c1   : > { %v3261_v14 = vpop.f32.mrb[23].mxu0 }
 0x8c2   : > { %v2063_v19 = vadd.f32 %v3259_v54, %v3145_v58  ;;  %v3262_v21 = vadd.f32 %v3261_v14, %v3260_v55 }
 0x8c4   : > { %v2066_v59 = vadd.f32 %v3262_v21, %v3145_v58  ;;  %v2077_v60 = vadd.f32 %v2063_v19, %v4271_v12 }
 0x8c6   : > { %2083 = vadd.xlane.f32.xlu0 %v2077_v60  ;;  %v2078_v61 = vadd.f32 %v2066_v59, %v4273_v13  ;;  %v3595_v13 = vld [vmem:[%s4204_s6 + $0x14] ss:$8 sps:$4 sm:$0xff]  }
 0x8c7   : > { %2260 = vmatprep.subr.bf16.mxu1 %v3595_v13 }
 0x8c8   : > { %2085 = vadd.xlane.f32.xlu1 %v2078_v61  ;;  %2261 = vmatpush1.bf16.msra.mxu1 %v3593_v8 }
 0x8c9   : > { %2262 = vmatprep.subr.bf16.mxu1 %v3598_v25  ;;  %v2166_v25 = vld [vmem:[%s4214_s5] sm:$0x3] }
 0x8cc   : > { %2263 = vmatpush1.bf16.msra.mxu1 %v3596_v29  ;;  %v2171_v29 = vrot.slane %v2166_v25, %v986_v44 }
 0x8cd   : > { %2264 = vmatprep.subr.bf16.mxu1 %v3601_v31 }
 0x8ce   : > { %v3263_v62 = vpop.f32.mrb[24].mxu0 }
 0x8cf   : > { %v3264_v63 = vpop.f32.mrb[25].mxu0 }
 0x8d0   : > { %v3265_v0 = vadd.f32 %v3264_v63, %v3263_v62  ;;  %v3266_v1 = vpop.f32.mrb[26].mxu0  ;;  %2265 = vmatpush1.bf16.msra.mxu1 %v3599_v33 }
 0x8d1   : > { %v3267_v2 = vpop.f32.mrb[27].mxu0  ;;  %2266 = vmatprep.subr.bf16.mxu1 %v3604_v34 }
 0x8d2   : > { %v2071_v3 = vadd.f32 %v3265_v0, %v3145_v58  ;;  %v3268_v4 = vadd.f32 %v3267_v2, %v3266_v1 }
 0x8d4   : > { %v2074_v5 = vadd.f32 %v3268_v4, %v3145_v58  ;;  %v2079_v45 = vadd.f32 %v2071_v3, %v4287_v23  ;;  %2267 = vmatpush1.bf16.msra.mxu1 %v3602_v35 }
 0x8d5   : > { %2268 = vmatprep.subr.bf16.mxu1 %v3607_v42 }
 0x8d6   : > { %2087 = vadd.xlane.f32.xlu0 %v2079_v45  ;;  %v2080_v12 = vadd.f32 %v2074_v5, %v4289_v24 }
 0x8d8   : > { %2089 = vadd.xlane.f32.xlu1 %v2080_v12  ;;  %2269 = vmatpush1.bf16.msra.mxu1 %v3605_v50 }
 0x8d9   : > { %2270 = vmatprep.subr.bf16.mxu1 %v3610_v53 }
 0x8dc   : > { %2271 = vmatpush1.bf16.msra.mxu1 %v3608_v41 }
 0x8dd   : > { %2272 = vmatprep.subr.bf16.mxu1 %v3613_v36 }
 0x8e0   : > { %2273 = vmatpush1.bf16.msra.mxu1 %v3611_v37 }
 0x953   : > { %v2084_v9 = vpop.xlane.xlu0 %2083 }
 0x954   : > { %v2092_v10 = vmul.f32 0.0078125, %v2084_v9  ;;  %v3615_v9 = vld [vmem:[%s4163_s17] sm:$0xff]  }
 0x955   : > { %v2086_v11 = vpop.xlane.xlu1 %2085 }
 0x956   : > { %v2096_v15 = vsub.f32 %v2077_v60, %v2092_v10  ;;  %v2093_v16 = vmul.f32 0.0078125, %v2086_v11  ;;  %v3616_v10 = vld [vmem:[%s4163_s17 + $0x48] sm:$0xff]  }
 0x957   : > { %v3617_v11 = vld [vmem:[%s4163_s17 + $0x8] sm:$0xff]  }
 0x958   : > { %v2097_v23 = vsub.f32 %v2078_v61, %v2093_v16  ;;  %v2100_v18 = vmul.f32 %v2096_v15, %v2096_v15  ;;  %v3163_v61 = vld [vmem:[%s4683_s29] ss:$0 sm:$0xff]  ;;  %v3619_v16 = vld [vmem:[%s4163_s17 + $0x10] sm:$0xff]  }
 0x95a   : > { %2104 = vadd.xlane.f32.xlu0 %v2100_v18  ;;  %v2101_v24 = vmul.f32 %v2097_v23, %v2097_v23  ;;  %v3621_v18 = vld [vmem:[%s4163_s17 + $0x18] sm:$0xff]  }
 0x95c   : > { %2106 = vadd.xlane.f32.xlu1 %v2101_v24  ;;  %v3622_v24 = vld [vmem:[%s4163_s17 + $0x60] sm:$0xff]  }
 0x963   : > { %v2088_v17 = vpop.xlane.xlu0 %2087 }
 0x964   : > { %v2094_v20 = vmul.f32 0.0078125, %v2088_v17  ;;  %v3623_v17 = vld [vmem:[%s4163_s17 + $0x20] sm:$0xff]  }
 0x965   : > { %v2090_v22 = vpop.xlane.xlu1 %2089 }
 0x966   : > { %v2098_v26 = vsub.f32 %v2079_v45, %v2094_v20  ;;  %v2095_v27 = vmul.f32 0.0078125, %v2090_v22  ;;  %v3624_v20 = vld [vmem:[%s4163_s17 + $0x68] sm:$0xff]  }
 0x967   : > { %v3625_v22 = vld [vmem:[%s4163_s17 + $0x28] sm:$0xff]  }
 0x968   : > { %v2099_v28 = vsub.f32 %v2080_v12, %v2095_v27  ;;  %v2102_v30 = vmul.f32 %v2098_v26, %v2098_v26  ;;  %v3627_v27 = vld [vmem:[%s4163_s17 + $0x30] sm:$0xff]  }
 0x96a   : > { %2108 = vadd.xlane.f32.xlu0 %v2102_v30  ;;  %v2103_v32 = vmul.f32 %v2099_v28, %v2099_v28  ;;  %v3629_v30 = vld [vmem:[%s4163_s17 + $0x38] sm:$0xff]  }
 0x96c   : > { %2110 = vadd.xlane.f32.xlu1 %v2103_v32  ;;  %v2175_v32 = vrot.slane %v2166_v25, %v990_v46 }
 0x9e7   : > { %v2105_v38 = vpop.xlane.xlu0 %2104 }
 0x9e8   : > { %v2112_v39 = vmul.f32 0.0078125, %v2105_v38 }
 0x9e9   : > { %v2107_v40 = vpop.xlane.xlu1 %2106 }
 0x9ea   : > { %v2116_v47 = vadd.f32 1e-12, %v2112_v39  ;;  %v2113_v48 = vmul.f32 0.0078125, %v2107_v40 }
 0x9ec   : > { %3662 = vrsqrt.f32 %v2116_v47  ;;  %v2117_v51 = vadd.f32 1e-12, %v2113_v48 }
 0x9ee   : > { %3664 = vrsqrt.f32 %v2117_v51 }
 0x9f6   : > { %v3663_v56 = vpop.eup %3662 }
 0x9f7   : > { %v2124_v58 = vmul.f32 %v3663_v56, %v2096_v15  ;;  %v2109_v49 = vpop.xlane.xlu0 %2108  ;;  %v3618_v15 = vld [vmem:[%s4163_s17 + $0x50] sm:$0xff]  }
 0x9f8   : > { %v3665_v54 = vpop.eup %3664  ;;  %v2114_v55 = vmul.f32 0.0078125, %v2109_v49 }
 0x9f9   : > { %v2125_v14 = vmul.f32 %v3665_v54, %v2097_v23  ;;  %v2111_v19 = vpop.xlane.xlu1 %2110  ;;  %v2134_v21 = vmul.f32 %v3162_v57, %v2124_v58  ;;  %v3620_v23 = vld [vmem:[%s4163_s17 + $0x58] sm:$0xff]  }
 0x9fa   : > { %v2118_v59 = vadd.f32 1e-12, %v2114_v55  ;;  %v2115_v60 = vmul.f32 0.0078125, %v2111_v19 }
 0x9fb   : > { %v2135_v62 = vmul.f32 %v3162_v57, %v2125_v14  ;;  %v4484_v0 = vadd.f32 %v3163_v61, %v2134_v21 }
 0x9fc   : > { %3666 = vrsqrt.f32 %v2118_v59  ;;  %v2119_v63 = vadd.f32 1e-12, %v2115_v60 }
 0x9fd   : > { %v4486_v1 = vadd.f32 %v3163_v61, %v2135_v62 }
 0x9fe   : > { %3668 = vrsqrt.f32 %v2119_v63 }
 0x9ff   : > { %v2148_v2 = vpack.c.bf16 %v4486_v1, %v4484_v0 }
 0xa01   : > { %2291 = vmatmul.mubr.bf16.vlgmr.msra.gmra.mrb[36].mxu1 %v2148_v2 }
 0xa02   : > { %2300 = vmatprep.mubr.bf16.mxu1 %v3881_v52  ;;  %v3614_v52 = vld [vmem:[%s4163_s17 + $0x40] sm:$0xff]  }
 0xa03   : > { %3269 = vmatprep.subr.bf16.mxu0 %v3614_v52 }
 0xa04   : > { %3270 = vmatpush3.bf16.msra.mxu0 %v3615_v9 }
 0xa05   : > { %3271 = vmatprep.subr.bf16.mxu0 %v3616_v10 }
 0xa06   : > { %v3667_v3 = vpop.eup %3666 }
 0xa07   : > { %v2126_v4 = vmul.f32 %v3667_v3, %v2098_v26  ;;  %v3626_v26 = vld [vmem:[%s4163_s17 + $0x70] sm:$0xff]  }
 0xa08   : > { %v3669_v5 = vpop.eup %3668  ;;  %3272 = vmatpush3.bf16.msra.mxu0 %v3617_v11 }
 0xa09   : > { %v2127_v45 = vmul.f32 %v3669_v5, %v2099_v28  ;;  %v2136_v12 = vmul.f32 %v3162_v57, %v2126_v4  ;;  %3273 = vmatprep.subr.bf16.mxu0 %v3618_v15  ;;  %v3628_v28 = vld [vmem:[%s4163_s17 + $0x78] sm:$0xff]  }
 0xa0b   : > { %v2137_v6 = vmul.f32 %v3162_v57, %v2127_v45  ;;  %v4491_v7 = vadd.f32 %v3163_v61, %v2136_v12 }
 0xa0c   : > { %3274 = vmatpush3.bf16.msra.mxu0 %v3619_v16 }
 0xa0d   : > { %v4493_v13 = vadd.f32 %v3163_v61, %v2137_v6  ;;  %3275 = vmatprep.subr.bf16.mxu0 %v3620_v23 }
 0xa0f   : > { %v2149_v8 = vpack.c.bf16 %v4493_v13, %v4491_v7 }
 0xa10   : > { %3276 = vmatpush3.bf16.msra.mxu0 %v3621_v18 }
 0xa11   : > { %2301 = vmatmul.mubr.bf16.gmra.mrb[40].mxu1 %v2149_v8  ;;  %3277 = vmatprep.subr.bf16.mxu0 %v3622_v24 }
 0xa14   : > { %3278 = vmatpush3.bf16.msra.mxu0 %v3623_v17 }
 0xa15   : > { %3279 = vmatprep.subr.bf16.mxu0 %v3624_v20 }
 0xa18   : > { %3280 = vmatpush3.bf16.msra.mxu0 %v3625_v22 }
 0xa19   : > { %3281 = vmatprep.subr.bf16.mxu0 %v3626_v26 }
 0xa1c   : > { %3282 = vmatpush3.bf16.msra.mxu0 %v3627_v27 }
 0xa1d   : > { %3283 = vmatprep.subr.bf16.mxu0 %v3628_v28 }
 0xa20   : > { %3284 = vmatpush3.bf16.msra.mxu0 %v3629_v30 }
 0xad4   : > { %v2292_v31 = vpop.f32.mrb[36].mxu1 }
 0xad5   : > { %v2293_v33 = vadd.f32 %v2292_v31, %v2171_v29  ;;  %v2294_v34 = vpop.f32.mrb[37].mxu1 }
 0xad6   : > { %v2295_v35 = vadd.f32 %v2294_v34, %v2175_v32  ;;  %v2296_v42 = vpop.f32.mrb[38].mxu1 }
 0xad7   : > { %v2319_v50 = vmul.f32 0.044715, %v2293_v33  ;;  %v2297_v53 = vadd.f32 %v2296_v42, %v2171_v29  ;;  %v2298_v41 = vpop.f32.mrb[39].mxu1  ;;  %v2311_v16 = vmul.f32 0.5, %v2293_v33 }
 0xad8   : > { %v2320_v36 = vmul.f32 0.044715, %v2295_v35  ;;  %v2299_v37 = vadd.f32 %v2298_v41, %v2175_v32  ;;  %v2312_v22 = vmul.f32 0.5, %v2295_v35 }
 0xad9   : > { %v2327_v38 = vmul.f32 %v2319_v50, %v2293_v33  ;;  %v2321_v39 = vmul.f32 0.044715, %v2297_v53  ;;  %v2313_v30 = vmul.f32 0.5, %v2297_v53 }
 0xada   : > { %v2328_v40 = vmul.f32 %v2320_v36, %v2295_v35  ;;  %v2322_v47 = vmul.f32 0.044715, %v2299_v37  ;;  %v2314_v31 = vmul.f32 0.5, %v2299_v37 }
 0xadb   : > { %v2335_v48 = vmul.f32 %v2327_v38, %v2293_v33  ;;  %v2329_v51 = vmul.f32 %v2321_v39, %v2297_v53 }
 0xadc   : > { %v2336_v44 = vmul.f32 %v2328_v40, %v2295_v35  ;;  %v2330_v56 = vmul.f32 %v2322_v47, %v2299_v37 }
 0xadd   : > { %v2343_v43 = vadd.f32 %v2335_v48, %v2293_v33  ;;  %v2337_v46 = vmul.f32 %v2329_v51, %v2297_v53 }
 0xade   : > { %v2338_v57 = vmul.f32 %v2330_v56, %v2299_v37  ;;  %v2344_v58 = vadd.f32 %v2336_v44, %v2295_v35 }
 0xadf   : > { %v2351_v49 = vmul.f32 0.7978846, %v2343_v43  ;;  %v2345_v54 = vadd.f32 %v2337_v46, %v2297_v53 }
 0xae0   : > { %v2346_v55 = vadd.f32 %v2338_v57, %v2299_v37  ;;  %v2352_v14 = vmul.f32 0.7978846, %v2344_v58 }
 0xae1   : > { %3670 = vtanh.f32 %v2351_v49  ;;  %v2353_v19 = vmul.f32 0.7978846, %v2345_v54 }
 0xae2   : > { %v2354_v21 = vmul.f32 0.7978846, %v2346_v55  ;;  %3672 = vtanh.f32 %v2352_v14 }
 0xae3   : > { %3674 = vtanh.f32 %v2353_v19 }
 0xae4   : > { %v2302_v59 = vpop.f32.mrb[40].mxu1  ;;  %3676 = vtanh.f32 %v2354_v21 }
 0xae5   : > { %v2303_v60 = vadd.f32 %v2302_v59, %v2171_v29  ;;  %v2304_v61 = vpop.f32.mrb[41].mxu1 }
 0xae6   : > { %v2305_v62 = vadd.f32 %v2304_v61, %v2175_v32  ;;  %v2306_v63 = vpop.f32.mrb[42].mxu1 }
 0xae7   : > { %v2323_v2 = vmul.f32 0.044715, %v2303_v60  ;;  %v2307_v3 = vadd.f32 %v2306_v63, %v2171_v29  ;;  %v2308_v4 = vpop.f32.mrb[43].mxu1  ;;  %v2315_v57 = vmul.f32 0.5, %v2303_v60 }
 0xae8   : > { %v2324_v5 = vmul.f32 0.044715, %v2305_v62  ;;  %v2309_v45 = vadd.f32 %v2308_v4, %v2175_v32  ;;  %v2316_v54 = vmul.f32 0.5, %v2305_v62 }
 0xae9   : > { %v2331_v12 = vmul.f32 %v2323_v2, %v2303_v60  ;;  %v2325_v6 = vmul.f32 0.044715, %v2307_v3  ;;  %v2317_v58 = vmul.f32 0.5, %v2307_v3 }
 0xaea   : > { %v2332_v8 = vmul.f32 %v2324_v5, %v2305_v62  ;;  %v2326_v52 = vmul.f32 0.044715, %v2309_v45  ;;  %v2318_v55 = vmul.f32 0.5, %v2309_v45  ;;  %v3180_v5 = vld [vmem:[%s4684_s28] ss:$0 sm:$0xff] }
 0xaeb   : > { %v3671_v9 = vpop.eup %3670  ;;  %v2339_v10 = vmul.f32 %v2331_v12, %v2303_v60  ;;  %v2333_v11 = vmul.f32 %v2325_v6, %v2307_v3 }
 0xaec   : > { %v3673_v15 = vpop.eup %3672  ;;  %v2340_v23 = vmul.f32 %v2332_v8, %v2305_v62  ;;  %v2334_v18 = vmul.f32 %v2326_v52, %v2309_v45  ;;  %v2367_v24 = vadd.f32 1.0, %v3671_v9 }
 0xaed   : > { %v3675_v17 = vpop.eup %3674  ;;  %v2341_v20 = vmul.f32 %v2333_v11, %v2307_v3  ;;  %v2368_v26 = vadd.f32 1.0, %v3673_v15  ;;  %v2347_v27 = vadd.f32 %v2339_v10, %v2303_v60 }
 0xaee   : > { %v3677_v28 = vpop.eup %3676  ;;  %v2342_v25 = vmul.f32 %v2334_v18, %v2309_v45  ;;  %v2369_v29 = vadd.f32 1.0, %v3675_v17  ;;  %v2348_v32 = vadd.f32 %v2340_v23, %v2305_v62  ;;  %v2375_v41 = vmul.f32 %v2367_v24, %v2311_v16 }
 0xaef   : > { %v2370_v34 = vadd.f32 1.0, %v3677_v28  ;;  %v2349_v42 = vadd.f32 %v2341_v20, %v2307_v3  ;;  %v2355_v50 = vmul.f32 0.7978846, %v2347_v27  ;;  %v2376_v39 = vmul.f32 %v2368_v26, %v2312_v22 }
 0xaf0   : > { %v2377_v36 = vmul.f32 %v2369_v29, %v2313_v30  ;;  %v2350_v33 = vadd.f32 %v2342_v25, %v2309_v45  ;;  %v2356_v38 = vmul.f32 0.7978846, %v2348_v32 }
 0xaf1   : > { %v2378_v40 = vmul.f32 %v2370_v34, %v2314_v31  ;;  %v2357_v47 = vmul.f32 0.7978846, %v2349_v42  ;;  %3678 = vtanh.f32 %v2355_v50 }
 0xaf2   : > { %v2383_v35 = vpack.c.bf16 %v2377_v36, %v2375_v41  ;;  %v2358_v48 = vmul.f32 0.7978846, %v2350_v33  ;;  %3680 = vtanh.f32 %v2356_v38 }
 0xaf3   : > { %v2384_v51 = vpack.c.bf16 %v2378_v40, %v2376_v39  ;;  %3682 = vtanh.f32 %v2357_v47 }
 0xaf4   : > { %3684 = vtanh.f32 %v2358_v48  ;;  %v3197_v48 = vld [vmem:[%s844_s26] ss:$0 sm:$0xff]  ;;  %s4689_s26 = sld [smem:[#allocation31_spill]] (!%p3199_p8) }
 0xaf5   : > { %2554 = vmatprep.mubr.bf16.mxu0 %v2384_v51 }
 0xaf6   : > { %2555 = vmatmul.mubr.bf16.vlgmr.msra.gmra.mrb[28].mxu0 %v2383_v35 }
 0xafb   : > { %v3679_v53 = vpop.eup %3678 }
 0xafc   : > { %v3681_v37 = vpop.eup %3680  ;;  %v2371_v44 = vadd.f32 1.0, %v3679_v53 }
 0xafd   : > { %v3683_v56 = vpop.eup %3682  ;;  %v2372_v43 = vadd.f32 1.0, %v3681_v37 }
 0xafe   : > { %v3685_v46 = vpop.eup %3684  ;;  %v2373_v49 = vadd.f32 1.0, %v3683_v56  ;;  %v2379_v19 = vmul.f32 %v2371_v44, %v2315_v57  ;;  %v3198_v44 = vld [vmem:[%s847_s21] ss:$0 sm:$0xff]  ;;  %s4687_s21 = sld [smem:[#allocation28_spill]] (!%p3199_p8) }
 0xaff   : > { %v2374_v14 = vadd.f32 1.0, %v3685_v46  ;;  %v2380_v59 = vmul.f32 %v2372_v43, %v2316_v54 }
 0xb00   : > { %v2381_v21 = vmul.f32 %v2373_v49, %v2317_v58 }
 0xb01   : > { %v2382_v61 = vmul.f32 %v2374_v14, %v2318_v55 }
 0xb02   : > { %v2385_v63 = vpack.c.bf16 %v2381_v21, %v2379_v19 }
 0xb03   : > { %v2386_v2 = vpack.c.bf16 %v2382_v61, %v2380_v59 }
 0xb05   : > { %2562 = vmatprep.mubr.bf16.mxu0 %v2386_v2 }
 0xb06   : > { %2563 = vmatmul.mubr.bf16.gmra.mrb[32].mxu0 %v2385_v63 }
 0xbc9   : > { %v3285_v4 = vpop.f32.mrb[28].mxu0 }
 0xbca   : > { %v3286_v60 = vpop.f32.mrb[29].mxu0 }
 0xbcb   : > { %v3287_v3 = vadd.f32 %v3286_v60, %v3285_v4  ;;  %v3288_v12 = vpop.f32.mrb[30].mxu0 }
 0xbcc   : > { %v3289_v62 = vpop.f32.mrb[31].mxu0 }
 0xbcd   : > { %v2557_v45 = vadd.f32 %v3287_v3, %v3180_v5  ;;  %v3290_v6 = vadd.f32 %v3289_v62, %v3288_v12  ;;  %v3694_v3 = vld [vmem:[%s4687_s21] sm:$0xff] (!%p3199_p8)   ;;  %v3884_v12 = vmov (!%p3199_p8), 0.0   ;;  %v3695_v62 = vld [vmem:[%s4687_s21 + $0x8] sm:$0xff] (!%p3199_p8)  }
 0xbce   : > { %3363 = vmatprep.subr.bf16.mxu0 (!%p3199_p8), %v3884_v12  ;;  %3383 = vmatprep.subr.bf16.mxu1 (!%p3199_p8), %v3884_v12 }
 0xbcf   : > { %v2560_v8 = vadd.f32 %v3290_v6, %v3180_v5  ;;  %v2571_v52 = vadd.f32 %v2557_v45, %v4484_v0  ;;  %3364 = vmatpush3.bf16.msra.mxu0 (!%p3199_p8), %v3694_v3  ;;  %3379 = vmatprep.mubr.msk.bf16.mxu0 (!%p3199_p8), %vm3885_vm2, %v3884_v12  ;;  %v3696_v45 = vld [vmem:[%s4687_s21 + $0x10] sm:$0xff] (!%p3199_p8)   ;;  %v3702_v6 = vld [vmem:[#allocation9] sm:$0xff] (!%p3199_p8)  }
 0xbd0   : > { %3365 = vmatprep.subr.bf16.mxu0 (!%p3199_p8), %v3884_v12  ;;  %3399 = vmatprep.mubr.msk.bf16.mxu1 (!%p3199_p8), %vm3885_vm2, %v3884_v12 }
 0xbd1   : > { %2577 = vadd.xlane.f32.xlu0 %v2571_v52  ;;  %v2572_v9 = vadd.f32 %v2560_v8, %v4486_v1  ;;  %v3697_v8 = vld [vmem:[%s4687_s21 + $0x18] sm:$0xff] (!%p3199_p8)   ;;  %3384 = vmatpush3.bf16.msra.mxu1 (!%p3199_p8), %v3702_v6 }
 0xbd2   : > { %3385 = vmatprep.subr.bf16.mxu1 (!%p3199_p8), %v3884_v12 }
 0xbd3   : > { %2579 = vadd.xlane.f32.xlu1 %v2572_v9  ;;  %3366 = vmatpush3.bf16.msra.mxu0 (!%p3199_p8), %v3695_v62 }
 0xbd4   : > { %3367 = vmatprep.subr.bf16.mxu0 (!%p3199_p8), %v3884_v12 }
 0xbd7   : > { %3368 = vmatpush3.bf16.msra.mxu0 (!%p3199_p8), %v3696_v45 }
 0xbd8   : > { %3369 = vmatprep.subr.bf16.mxu0 (!%p3199_p8), %v3884_v12 }
 0xbd9   : > { %v3291_v10 = vpop.f32.mrb[32].mxu0 }
 0xbda   : > { %v3292_v11 = vpop.f32.mrb[33].mxu0 }
 0xbdb   : > { %v3293_v15 = vadd.f32 %v3292_v11, %v3291_v10  ;;  %v3294_v16 = vpop.f32.mrb[34].mxu0  ;;  %v3704_v10 = vld [vmem:[#allocation9 + $0x10] sm:$0xff] (!%p3199_p8)   ;;  %3370 = vmatpush3.bf16.msra.mxu0 (!%p3199_p8), %v3697_v8  ;;  %v3699_v11 = vld [vmem:[%s4687_s21 + $0x28] sm:$0xff] (!%p3199_p8)  }
 0xbdc   : > { %v3295_v23 = vpop.f32.mrb[35].mxu0  ;;  %3371 = vmatprep.subr.bf16.mxu0 (!%p3199_p8), %v3884_v12 }
 0xbdd   : > { %v2565_v18 = vadd.f32 %v3293_v15, %v3180_v5  ;;  %v3296_v24 = vadd.f32 %v3295_v23, %v3294_v16  ;;  %v3705_v15 = vld [vmem:[#allocation9 + $0x18] sm:$0xff] (!%p3199_p8)   ;;  %v3700_v16 = vld [vmem:[%s4687_s21 + $0x30] sm:$0xff] (!%p3199_p8)  }
 0xbdf   : > { %v2568_v17 = vadd.f32 %v3296_v24, %v3180_v5  ;;  %v2573_v20 = vadd.f32 %v2565_v18, %v4491_v7  ;;  %v3701_v18 = vld [vmem:[%s4687_s21 + $0x38] sm:$0xff] (!%p3199_p8)  }
 0xbe1   : > { %2581 = vadd.xlane.f32.xlu0 %v2573_v20  ;;  %v2574_v22 = vadd.f32 %v2568_v17, %v4493_v13 }
 0xbe3   : > { %2583 = vadd.xlane.f32.xlu1 %v2574_v22 }
 0xc5e   : > { %v2578_v26 = vpop.xlane.xlu0 %2577 }
 0xc5f   : > { %v2585_v0 = vmul.f32 0.0078125, %v2578_v26  ;;  %v3708_v26 = vld [vmem:[#allocation9 + $0x30] sm:$0xff] (!%p3199_p8)  }
 0xc60   : > { %v2580_v27 = vpop.xlane.xlu1 %2579 }
 0xc61   : > { %v2589_v28 = vsub.f32 %v2571_v52, %v2585_v0  ;;  %v2586_v1 = vmul.f32 0.0078125, %v2580_v27  ;;  %v3703_v52 = vld [vmem:[#allocation9 + $0x8] sm:$0xff] (!%p3199_p8)   ;;  %v3709_v0 = vld [vmem:[#allocation9 + $0x38] sm:$0xff] (!%p3199_p8)   ;;  %v3200_v27 = vld [vmem:[%s4688_s27] ss:$0 sm:$0xff] (!%p3199_p8) }
 0xc62   : > { %3386 = vmatpush3.bf16.msra.mxu1 (!%p3199_p8), %v3703_v52 }
 0xc63   : > { %v2590_v30 = vsub.f32 %v2572_v9, %v2586_v1  ;;  %v2593_v25 = vmul.f32 %v2589_v28, %v2589_v28  ;;  %v3698_v9 = vld [vmem:[%s4687_s21 + $0x20] sm:$0xff] (!%p3199_p8)   ;;  %3387 = vmatprep.subr.bf16.mxu1 (!%p3199_p8), %v3884_v12 }
 0xc64   : > { %3372 = vmatpush3.bf16.msra.mxu0 (!%p3199_p8), %v3698_v9 }
 0xc65   : > { %2597 = vadd.xlane.f32.xlu0 %v2593_v25  ;;  %v2594_v29 = vmul.f32 %v2590_v30, %v2590_v30  ;;  %3373 = vmatprep.subr.bf16.mxu0 (!%p3199_p8), %v3884_v12 }
 0xc66   : > { %3388 = vmatpush3.bf16.msra.mxu1 (!%p3199_p8), %v3704_v10 }
 0xc67   : > { %2599 = vadd.xlane.f32.xlu1 %v2594_v29  ;;  %3389 = vmatprep.subr.bf16.mxu1 (!%p3199_p8), %v3884_v12 }
 0xc68   : > { %3374 = vmatpush3.bf16.msra.mxu0 (!%p3199_p8), %v3699_v11 }
 0xc69   : > { %3375 = vmatprep.subr.bf16.mxu0 (!%p3199_p8), %v3884_v12 }
 0xc6a   : > { %3390 = vmatpush3.bf16.msra.mxu1 (!%p3199_p8), %v3705_v15 }
 0xc6b   : > { %3391 = vmatprep.subr.bf16.mxu1 (!%p3199_p8), %v3884_v12 }
 0xc6c   : > { %3376 = vmatpush3.bf16.msra.mxu0 (!%p3199_p8), %v3700_v16 }
 0xc6d   : > { %3377 = vmatprep.subr.bf16.mxu0 (!%p3199_p8), %v3884_v12 }
 0xc6e   : > { %v2582_v32 = vpop.xlane.xlu0 %2581 }
 0xc6f   : > { %v2587_v31 = vmul.f32 0.0078125, %v2582_v32 }
 0xc70   : > { %v2584_v34 = vpop.xlane.xlu1 %2583  ;;  %3378 = vmatpush3.bf16.msra.mxu0 (!%p3199_p8), %v3701_v18 }
 0xc71   : > { %v2591_v42 = vsub.f32 %v2573_v20, %v2587_v31  ;;  %v2588_v7 = vmul.f32 0.0078125, %v2584_v34  ;;  %v3706_v20 = vld [vmem:[#allocation9 + $0x20] sm:$0xff] (!%p3199_p8)  }
 0xc72   : > { %3392 = vmatpush3.bf16.msra.mxu1 (!%p3199_p8), %v3706_v20  ;;  %v3209_v34 = vld [vmem:[%s4689_s26] ss:$0 sm:$0xff] (!%p3199_p8) }
 0xc73   : > { %v2592_v50 = vsub.f32 %v2574_v22, %v2588_v7  ;;  %v2595_v41 = vmul.f32 %v2591_v42, %v2591_v42  ;;  %3393 = vmatprep.subr.bf16.mxu1 (!%p3199_p8), %v3884_v12  ;;  %v3707_v22 = vld [vmem:[#allocation9 + $0x28] sm:$0xff] (!%p3199_p8)  }
 0xc75   : > { %2601 = vadd.xlane.f32.xlu0 %v2595_v41  ;;  %v2596_v13 = vmul.f32 %v2592_v50, %v2592_v50 }
 0xc76   : > { %3394 = vmatpush3.bf16.msra.mxu1 (!%p3199_p8), %v3707_v22 }
 0xc77   : > { %2603 = vadd.xlane.f32.xlu1 %v2596_v13  ;;  %3395 = vmatprep.subr.bf16.mxu1 (!%p3199_p8), %v3884_v12 }
 0xc7a   : > { %3396 = vmatpush3.bf16.msra.mxu1 (!%p3199_p8), %v3708_v26 }
 0xc7b   : > { %3397 = vmatprep.subr.bf16.mxu1 (!%p3199_p8), %v3884_v12 }
 0xc7e   : > { %3398 = vmatpush3.bf16.msra.mxu1 (!%p3199_p8), %v3709_v0 }
 0xcf2   : > { %v2598_v36 = vpop.xlane.xlu0 %2597 }
 0xcf3   : > { %v2605_v33 = vmul.f32 0.0078125, %v2598_v36 }
 0xcf4   : > { %v2600_v38 = vpop.xlane.xlu1 %2599 }
 0xcf5   : > { %v2609_v39 = vadd.f32 1e-12, %v2605_v33  ;;  %v2606_v40 = vmul.f32 0.0078125, %v2600_v38 }
 0xcf7   : > { %3686 = vrsqrt.f32 %v2609_v39  ;;  %v2610_v47 = vadd.f32 1e-12, %v2606_v40 }
 0xcf9   : > { %3688 = vrsqrt.f32 %v2610_v47 }
 0xd01   : > { %v3687_v35 = vpop.eup %3686 }
 0xd02   : > { %v2617_v51 = vmul.f32 %v3687_v35, %v2589_v28  ;;  %v2602_v53 = vpop.xlane.xlu0 %2601 }
 0xd03   : > { %v3689_v37 = vpop.eup %3688  ;;  %v2607_v56 = vmul.f32 0.0078125, %v2602_v53 }
 0xd04   : > { %v2627_v43 = vmul.f32 %v3197_v48, %v2617_v51  ;;  %v2618_v46 = vmul.f32 %v3689_v37, %v2590_v30  ;;  %v2604_v57 = vpop.xlane.xlu1 %2603 }
 0xd05   : > { %v2611_v58 = vadd.f32 1e-12, %v2607_v56  ;;  %v2608_v49 = vmul.f32 0.0078125, %v2604_v57 }
 0xd06   : > { %v2637_v54 = vadd.f32 %v3198_v44, %v2627_v43  ;;  %v2628_v55 = vmul.f32 %v3197_v48, %v2618_v46 }
 0xd07   : > { %3690 = vrsqrt.f32 %v2611_v58  ;;  %v2612_v14 = vadd.f32 1e-12, %v2608_v49 }
 0xd08   : > { %2641 = vst [vmem:[#allocation2] sm:$0xff] %v2637_v54  ;;  %v2638_v19 = vadd.f32 %v3198_v44, %v2628_v55 }
 0xd09   : > { %3692 = vrsqrt.f32 %v2612_v14 }
 0xd0a   : > { %2642 = vst [vmem:[#allocation2 + $0x8] sm:$0xff] %v2638_v19 }
 0xd11   : > { %v3691_v21 = vpop.eup %3690 }
 0xd12   : > { %v2619_v59 = vmul.f32 %v3691_v21, %v2591_v42 }
 0xd13   : > { %v3693_v61 = vpop.eup %3692 }
 0xd14   : > { %v2629_v63 = vmul.f32 %v3197_v48, %v2619_v59  ;;  %v2620_v2 = vmul.f32 %v3693_v61, %v2592_v50  ;;  %2648 = sbr.rel (%p3199_p8) target bundleno = 3799 (0xed7), region = 120 }
 0xd16   : > { %v2639_v4 = vadd.f32 %v3198_v44, %v2629_v63  ;;  %v2630_v5 = vmul.f32 %v3197_v48, %v2620_v2 }
 0xd18   : > { %2643 = vst [vmem:[#allocation2 + $0x10] sm:$0xff] %v2639_v4  ;;  %v2640_v60 = vadd.f32 %v3198_v44, %v2630_v5  ;;  %v2650_v23 = vrot.slane (!%p3199_p8), %v2639_v4, 7 }
 0xd1a   : > { %2644 = vst [vmem:[#allocation2 + $0x18] sm:$0xff] %v2640_v60  ;;  %v2653_v24 = vsel (!%p3199_p8), %vm2652_vm3, %v2637_v54, %v2650_v23 }
 0xd1b   : > { %v2654_v17 = vpack.c.bf16 %v2653_v24, %v2653_v24 }
 0xd1d   : > { %3380 = vmatmul.mubr.bf16.vlgmr.msra.gmra.mrb[0].mxu0 %v2654_v17 }
 0xdf0   : > { %v2760_v28 = vpop.f32.mrb[0].mxu0 }
 0xdf1   : > { %v2761_v1 = vadd.f32 %v3200_v27, %v2760_v28  ;;  %v3381_v30 = vpop.f32.mrb[1].mxu0 }
 0xdf2   : > { %v2763_v25 = vpop.f32.mrb[2].mxu0 }
 0xdf3   : > { %3710 = vtanh.f32 %v2761_v1  ;;  %v3382_v29 = vpop.f32.mrb[3].mxu0 }
 0xdfd   : > { %v3711_v32 = vpop.eup %3710 }
 0xdfe   : > { %v2767_v31 = vpack.c.bf16 %v3711_v32, %v3711_v32 }
 0xe00   : > { %3400 = vmatmul.mubr.bf16.vlgmr.msra.gmra.mrb[0].mxu1 %v2767_v31 }
 0xed3   : > { %v2873_v42 = vpop.f32.mrb[0].mxu1 }
 0xed4   : > { %v2874_v7 = vadd.f32 %v3209_v34, %v2873_v42  ;;  %v3401_v50 = vpop.f32.mrb[1].mxu1 }
 0xed5   : > { %v2876_v41 = vpop.f32.mrb[2].mxu1 }
 0xed6   : > { %2879 = vst [vmem:[#allocation10] sm:$0x3] %v2874_v7  ;;  %v3402_v13 = vpop.f32.mrb[3].mxu1 }
 0xed7 PF: > { %p3449_p12 = scmp.eq.s32.totalorder %s4011_s2, 1  ;;  %s3886_s4 = smov [#allocation10]  }
 0xed8   : > { %s2887_s25 = sshll.u32 %s3886_s4, 4  ;;  %s2888_s25 = int_to_ptr.vmem [resolvable:$true] %s2887_s25 }
 0xed9   : > { %s3800_s23 = scalar_lea.vmem %s2888_s25, 32  ;;  %p3807_p3 = scmp.lt.s32.totalorder %s2888_s25, %s2888_s25 }
 0xeda   : > { %p3801_p0 = scmp.ne.s32.totalorder %s2888_s25, %s3800_s23  ;;  %p3808_p1 = scmp.lt.s32.totalorder %s3800_s23, %s3800_s23 }
 0xedc   : > { %p3802_p2 = pnand %p3801_p0, %p3449_p12  ;;  %p3809_p4 = por %p3808_p1, %p3807_p3 }
 0xede   : > { %p3803_p13 = pneg %p3802_p2 }
 0xee0   : > { %p3810_p11 = pnand %p3809_p4, %p3803_p13 }
 0xee2   : > { %3813 = shalt.err (!%p3810_p11)
}
 0xee3   : > { %s4690_s19 = sld [smem:[#allocation32_spill]] }
 0xee9   : > { %s3814_s6 = scalar_lea.hbm %s4690_s19, 32 }
 0xeea   : > { %p3815_p7 = scmp.ne.s32.totalorder %s4690_s19, %s3814_s6  ;;  %p3820_p6 = scmp.lt.u32.totalorder %s3814_s6, %s4690_s19 }
 0xeec   : > { %p3816_p10 = pnand %p3815_p7, %p3449_p12 }
 0xeee   : > { %p3817_p5 = pneg %p3816_p10 }
 0xef0   : > { %p3822_p9 = pnand %p3820_p6, %p3817_p5 }
 0xef2   : > { %3825 = shalt.err (!%p3822_p9)
}
 0xef3   : > { %3432 = dma.vmem_to_hbm [thread:$0]  (%p3449_p12), %s2888_s25, 32, %s4690_s19, [#allocation6]  }
 0xef4   : > { %3855 = dma.done.wait (%p3449_p12), [#allocation6], 32  }
 0xef5   : > { %3857 = vsyncadd (%p3449_p12), [#allocation6], 4294967264 }
 0xef6 PF: > { %s4691_s24 = sld [smem:[#allocation16_spill]]  ;;  %s4692_s18 = sld [smem:[#allocation15_spill]] }
 0xef7   : > { %s4693_s23 = sld [smem:[#allocation17_spill]]  ;;  %s4694_s1 = smov %s3864_s22 }
 0xefc   : > { %p34_p8 = scmp.ge.s32.totalorder %s4691_s24, 4   ;;  %s4695_s22 = smov %s4692_s18 }
 0xefe   :  { %36 = sbr.rel (!%p34_p8) target bundleno = 22 (0x16), region = 193 }
 0xf05   :  { %2900 = vsyncpa [#allocation5], 1 }
 0xf06   :  { %2902 = vsyncpa [#allocation5 + $0x1], 1 }
 0xf07   :  { %2903 = vsyncpa [#allocation8], 1 }
 0xf08   :  { %2905 = vsyncpa [#allocation8 + $0x1], 1 }
 0xf09   :  { %2906 = vsyncpa [#allocation6], 1 }
 0xf0a   :  { %2908 = vsyncpa [#allocation6 + $0x1], 1 }

</bundles_post_ra>
